<compile_context>
chip_gen: v6e
topology: v6e:2x2x1
jax: 0.10.0
libtpu: 0.0.40
codegen_flags: <defaults>
</compile_context>

<pallas_src>
import functools

import jax
import jax.numpy as jnp
from jax import lax
from jax.experimental import pallas as pl
from jax.experimental.pallas import tpu as pltpu


_SUBLANE = 8
_MAX_BLOCK_ROWS = 1024     # max tokens gathered per grid step
_NSEM = 32                 # max outstanding row DMAs in the HBM-gather path
_UNROLL = 8                # issue-loop unroll in the HBM-gather path

# Flipped to False (once) if this jax/Mosaic build cannot lower the vectorized in-VMEM
# gather (jnp.take); all subsequent calls then use the manual-DMA path.
_VECTOR_GATHER_OK = True


def _round_up(x: int, m: int) -> int:
    return ((x + m - 1) // m) * m


def _vmem_budget_bytes() -> int:
    """Per-TensorCore VMEM capacity (64 MiB on v7x, 128 MiB on v5e/v6e)."""
    try:
        cap = int(getattr(pltpu.get_tpu_info(), "vmem_capacity_bytes", 0) or 0)
        if cap > 0:
            return cap
    except Exception:
        pass
    return 64 * 1024 * 1024   # conservative default (v7x per-core VMEM)


def _pick_block_rows(n: int) -> int:
    """Rows gathered per grid step (multiple of 8).

    Big blocks amortize the ~0.35us per-grid-step overhead; for small/medium N we still
    aim for >=2 blocks so the 'parallel' grid axis can split across v7x's two
    TensorCores (a no-op on v5e/v6e)."""
    if n >= 2 * _MAX_BLOCK_ROWS:
        return _MAX_BLOCK_ROWS
    if n >= 2 * _SUBLANE:
        return min(_MAX_BLOCK_ROWS, _round_up((n + 1) // 2, _SUBLANE))
    return _round_up(max(n, 1), _SUBLANE)


# ---------------------------------------------------------------------------
# Path 1: table VMEM-resident, one vectorized gather per row block.
# ---------------------------------------------------------------------------
def _resident_gather_kernel(idx_ref, table_ref, out_ref):
    # idx_ref  : (1, BR) int32 VMEM block of row indices for this grid step
    # table_ref: (V, D)  VMEM, full table (constant index_map -> fetched once, resident)
    # out_ref  : (BR, D) VMEM output block
    out_ref[...] = jnp.take(table_ref[...], idx_ref[0, :], axis=0)


def _resident_forward(flat_idx, table, *, n, br, nb, need, budget):
    V, D = table.shape
    idx2d = flat_idx.reshape(nb, br)
    vmem_limit = int(min(0.9 * budget, max(32 << 20, need + (8 << 20))))
    return pl.pallas_call(
        _resident_gather_kernel,
        out_shape=jax.ShapeDtypeStruct((n, D), table.dtype),
        grid_spec=pltpu.PrefetchScalarGridSpec(
            num_scalar_prefetch=0,
            grid=(nb,),
            in_specs=[
                pl.BlockSpec((1, br), lambda i: (i, 0)),   # this block's indices -> VMEM
                pl.BlockSpec((V, D), lambda i: (0, 0)),    # whole table, resident
            ],
            out_specs=pl.BlockSpec((br, D), lambda i: (i, 0)),
        ),
        compiler_params=pltpu.CompilerParams(
            dimension_semantics=("parallel",),
            vmem_limit_bytes=vmem_limit,
        ),
    )(idx2d, table)


# ---------------------------------------------------------------------------
# Path 2: table stays unpadded in HBM; manual row DMAs, up to _NSEM in flight.
# ---------------------------------------------------------------------------
def _hbm_gather_kernel(idx_ref, table_hbm, out_ref, sem, *, n_valid: int):
    # idx_ref  : (nb*BR,) int32 SMEM (scalar prefetch), padded with row 0
    # table_hbm: (V, D)   HBM (memory_space=pl.ANY), unpadded; rows DMA'd directly
    # out_ref  : (BR, D)  VMEM output block (DMA destination)
    # sem      : (_NSEM,) DMA semaphores
    br = out_ref.shape[0]
    base = pl.program_id(0) * br
    window = min(_NSEM, br)

    def row_copy(slot, row):
        return pltpu.make_async_copy(
            table_hbm.at[pl.ds(row, 1), :],
            out_ref.at[pl.ds(slot, 1), :],
            sem.at[slot % window],
        )

    # Prime up to `window` outstanding row DMAs; rows past the end of the index stream
    # are skipped entirely (their output rows are never written back to HBM).
    for w in range(window):
        @pl.when(base + w < n_valid)
        def _(w=w):
            row_copy(w, idx_ref[base + w]).start()

    def body(r, carry):
        nxt = r + window
        # Hoist the next index's SMEM read above the wait (.wait() breaks SMEM sst->sld
        # forwarding); clamp so the read stays inside this block's prefetched indices.
        nxt_row = idx_ref[base + jnp.minimum(nxt, br - 1)]

        @pl.when(base + r < n_valid)
        def _():
            # Source row is irrelevant for a wait (only transfer size / semaphore matter).
            row_copy(r, 0).wait()

        @pl.when(jnp.logical_and(nxt < br, base + nxt < n_valid))
        def _():
            row_copy(nxt, nxt_row).start()

        return carry

    lax.fori_loop(0, br, body, 0, unroll=_UNROLL)


def _hbm_forward(flat_idx, table, *, n, br, nb, out_block_bytes, budget):
    V, D = table.shape
    vmem_limit = int(min(0.9 * budget, max(32 << 20, 2 * out_block_bytes + (8 << 20))))
    kernel = functools.partial(_hbm_gather_kernel, n_valid=n)
    # TODO(synk): for very large N (>~64K tokens) stream per-block index tiles instead of
    # scalar-prefetching the whole flattened index vector into SMEM (1-D SMEM arrays pad
    # to next_pow2(4N) bytes).
    return pl.pallas_call(
        kernel,
        out_shape=jax.ShapeDtypeStruct((n, D), table.dtype),
        grid_spec=pltpu.PrefetchScalarGridSpec(
            num_scalar_prefetch=1,
            grid=(nb,),
            in_specs=[pl.BlockSpec(memory_space=pl.ANY)],   # table stays in HBM, unpadded
            out_specs=pl.BlockSpec((br, D), lambda i, idx: (i, 0)),
            scratch_shapes=[pltpu.SemaphoreType.DMA((_NSEM,))],
        ),
        compiler_params=pltpu.CompilerParams(
            dimension_semantics=("parallel",),
            vmem_limit_bytes=vmem_limit,
        ),
    )(flat_idx, table)


def glove_embedding_forward(embedding_matrix: jax.Array,
                            input_indices: jax.Array,
                            *, force_hbm: bool = False) -> jax.Array:
    """Pallas embedding lookup: embedding_matrix[input_indices] (row gather)."""
    global _VECTOR_GATHER_OK

    V, D = embedding_matrix.shape
    dtype = embedding_matrix.dtype
    orig_shape = tuple(input_indices.shape)

    flat_idx = input_indices.reshape(-1).astype(jnp.int32)
    N = int(flat_idx.shape[0])
    if N == 0:
        return jnp.zeros(orig_shape + (D,), dtype=dtype)
    # Clamp so a bad index can never drive an out-of-range DMA / gather.
    flat_idx = jnp.clip(flat_idx, 0, V - 1)

    BR = _pick_block_rows(N)
    nb = -(-N // BR)
    Np = nb * BR
    if Np != N:
        flat_idx = jnp.pad(flat_idx, (0, Np - N))   # pad with row 0; never written back

    itemsize = jnp.dtype(dtype).itemsize
    budget = _vmem_budget_bytes()
    table_bytes = V * D * itemsize
    out_block_bytes = BR * D * itemsize
    idx_block_bytes = BR * 4
    # The full-extent table BlockSpec is still double-buffered by the pipeline: count 2x.
    resident_need = 2 * (table_bytes + out_block_bytes + idx_block_bytes)
    use_resident = (not force_hbm) and _VECTOR_GATHER_OK and (
        resident_need + (4 << 20) <= int(0.8 * budget))

    if use_resident:
        try:
            out = _resident_forward(flat_idx, embedding_matrix,
                                    n=N, br=BR, nb=nb,
                                    need=resident_need, budget=budget)
            return out.reshape(orig_shape + (D,))
        except Exception:
            # This jax/Mosaic build cannot lower the vectorized in-VMEM gather (or the
            # resident table did not fit) -> fall back to the manual-DMA path.
            _VECTOR_GATHER_OK = False

    out = _hbm_forward(flat_idx, embedding_matrix,
                       n=N, br=BR, nb=nb,
                       out_block_bytes=out_block_bytes, budget=budget)
    return out.reshape(orig_shape + (D,))


def make_embedding_matrix(vocab_size: int, embedding_dim: int) -> jax.Array:
    """Deterministic stand-in for the GloVe-loaded nn.Parameter."""
    key = jax.random.PRNGKey(0)
    mat = jax.random.normal(key, (vocab_size, embedding_dim), dtype=jnp.float32)
    # Mimic create_embedding_matrix: words not found in the GloVe file stay 0
    # (first 4 "rare" words and the 4 trailing <extra_*> tokens).
    mat = mat.at[:4].set(0.0)
    mat = mat.at[-4:].set(0.0)
    return mat


if __name__ == "__main__":
    root = jax.random.PRNGKey(0)
    k1, k2 = jax.random.split(root)

    # --- Case 1: small table -> VMEM-resident vectorized gather (or its safe fallback) --
    embedding_dim = 32
    vocab_size = 28 + 4          # vocab_list + <extra_1..4>
    emb = make_embedding_matrix(vocab_size, embedding_dim)

    idx = jax.random.randint(k1, (2, 8), 0, vocab_size, dtype=jnp.int32)
    out = jax.block_until_ready(glove_embedding_forward(emb, idx))
    ref = emb[idx.reshape(-1)].reshape(2, 8, embedding_dim)
    assert out.shape == (2, 8, embedding_dim)
    assert out.dtype == emb.dtype
    assert bool(jnp.allclose(out, ref))

    # --- Case 2: general HBM manual-DMA gather path (unpadded D=40 rows) ----------------
    embedding_dim2 = 40
    vocab_size2 = 1536
    emb2 = make_embedding_matrix(vocab_size2, embedding_dim2)

    idx2 = jax.random.randint(k2, (3, 7), 0, vocab_size2, dtype=jnp.int32)
    out2 = jax.block_until_ready(glove_embedding_forward(emb2, idx2, force_hbm=True))
    ref2 = emb2[idx2.reshape(-1)].reshape(3, 7, embedding_dim2)
    assert out2.shape == (3, 7, embedding_dim2)
    assert out2.dtype == emb2.dtype
    assert bool(jnp.allclose(out2, ref2))

    print("KERNEL_OK")
</pallas_src>

<mosaic_0001>
module attributes {stable_mosaic.version = 11 : i64} {
  func.func @_hbm_gather_kernel(%arg0: i32, %arg1: memref<16xi32, #tpu.memory_space<smem>>, %arg2: memref<32x32xf32, #tpu.memory_space<any>>, %arg3: memref<8x32xf32, #tpu.memory_space<vmem>>, %arg4: memref<32x!tpu.dma_semaphore, #tpu.memory_space<semaphore_mem>>) attributes {dimension_semantics = [#tpu.dimension_semantics<parallel>], iteration_bounds = array<i64: 2>, scalar_prefetch = 1 : i64, scratch_operands = 1 : i64, tpu.core_type = #tpu.core_type<tc>, window_params = [{}, {transform_indices = @transform_1, window_bounds = array<i64: 8, 32>}]} {
    %c8_i32 = arith.constant 8 : i32
    %0 = arith.muli %arg0, %c8_i32 : i32
    %c0_i32 = arith.constant 0 : i32
    %1 = arith.addi %0, %c0_i32 : i32
    %c16_i32 = arith.constant 16 : i32
    %2 = arith.cmpi slt, %1, %c16_i32 : i32
    %3 = arith.extui %2 : i1 to i32
    %c0_i32_0 = arith.constant 0 : i32
    %4 = arith.cmpi ne, %3, %c0_i32_0 : i32
    scf.if %4 {
      %c0_i32_80 = arith.constant 0 : i32
      %153 = arith.addi %0, %c0_i32_80 : i32
      %154 = arith.index_cast %153 : i32 to index
      %155 = memref.load %arg1[%154] : memref<16xi32, #tpu.memory_space<smem>>
      %c0_i32_81 = arith.constant 0 : i32
      %c0_i32_82 = arith.constant 0 : i32
      %156 = tpu.memref_slice %arg2[%155, %c0_i32_82] : memref<32x32xf32, #tpu.memory_space<any>> -> memref<1x32xf32, #tpu.memory_space<any>>
      %c0_i32_83 = arith.constant 0 : i32
      %c0_i32_84 = arith.constant 0 : i32
      %157 = tpu.memref_slice %arg3[%c0_i32_83, %c0_i32_84] : memref<8x32xf32, #tpu.memory_space<vmem>> -> memref<1x32xf32, #tpu.memory_space<vmem>>
      %158 = tpu.memref_slice %arg4[%c0_i32_81] : memref<32x!tpu.dma_semaphore, #tpu.memory_space<semaphore_mem>> -> memref<1x!tpu.dma_semaphore, #tpu.memory_space<semaphore_mem>>
      %159 = tpu.memref_squeeze %158 : memref<1x!tpu.dma_semaphore, #tpu.memory_space<semaphore_mem>> -> memref<!tpu.dma_semaphore, #tpu.memory_space<semaphore_mem>>
      tpu.enqueue_dma source(%156 : memref<1x32xf32, #tpu.memory_space<any>>) target(%157 : memref<1x32xf32, #tpu.memory_space<vmem>>) target_semaphore(%159 : memref<!tpu.dma_semaphore, #tpu.memory_space<semaphore_mem>>)
    } else {
    }
    %c1_i32 = arith.constant 1 : i32
    %5 = arith.addi %0, %c1_i32 : i32
    %c16_i32_1 = arith.constant 16 : i32
    %6 = arith.cmpi slt, %5, %c16_i32_1 : i32
    %7 = arith.extui %6 : i1 to i32
    %c0_i32_2 = arith.constant 0 : i32
    %8 = arith.cmpi ne, %7, %c0_i32_2 : i32
    scf.if %8 {
      %c1_i32_80 = arith.constant 1 : i32
      %153 = arith.addi %0, %c1_i32_80 : i32
      %154 = arith.index_cast %153 : i32 to index
      %155 = memref.load %arg1[%154] : memref<16xi32, #tpu.memory_space<smem>>
      %c1_i32_81 = arith.constant 1 : i32
      %c0_i32_82 = arith.constant 0 : i32
      %156 = tpu.memref_slice %arg2[%155, %c0_i32_82] : memref<32x32xf32, #tpu.memory_space<any>> -> memref<1x32xf32, #tpu.memory_space<any>>
      %c1_i32_83 = arith.constant 1 : i32
      %c0_i32_84 = arith.constant 0 : i32
      %157 = tpu.memref_slice %arg3[%c1_i32_83, %c0_i32_84] : memref<8x32xf32, #tpu.memory_space<vmem>> -> memref<1x32xf32, #tpu.memory_space<vmem>>
      %158 = tpu.memref_slice %arg4[%c1_i32_81] : memref<32x!tpu.dma_semaphore, #tpu.memory_space<semaphore_mem>> -> memref<1x!tpu.dma_semaphore, #tpu.memory_space<semaphore_mem>>
      %159 = tpu.memref_squeeze %158 : memref<1x!tpu.dma_semaphore, #tpu.memory_space<semaphore_mem>> -> memref<!tpu.dma_semaphore, #tpu.memory_space<semaphore_mem>>
      tpu.enqueue_dma source(%156 : memref<1x32xf32, #tpu.memory_space<any>>) target(%157 : memref<1x32xf32, #tpu.memory_space<vmem>>) target_semaphore(%159 : memref<!tpu.dma_semaphore, #tpu.memory_space<semaphore_mem>>)
    } else {
    }
    %c2_i32 = arith.constant 2 : i32
    %9 = arith.addi %0, %c2_i32 : i32
    %c16_i32_3 = arith.constant 16 : i32
    %10 = arith.cmpi slt, %9, %c16_i32_3 : i32
    %11 = arith.extui %10 : i1 to i32
    %c0_i32_4 = arith.constant 0 : i32
    %12 = arith.cmpi ne, %11, %c0_i32_4 : i32
    scf.if %12 {
      %c2_i32_80 = arith.constant 2 : i32
      %153 = arith.addi %0, %c2_i32_80 : i32
      %154 = arith.index_cast %153 : i32 to index
      %155 = memref.load %arg1[%154] : memref<16xi32, #tpu.memory_space<smem>>
      %c2_i32_81 = arith.constant 2 : i32
      %c0_i32_82 = arith.constant 0 : i32
      %156 = tpu.memref_slice %arg2[%155, %c0_i32_82] : memref<32x32xf32, #tpu.memory_space<any>> -> memref<1x32xf32, #tpu.memory_space<any>>
      %c2_i32_83 = arith.constant 2 : i32
      %c0_i32_84 = arith.constant 0 : i32
      %157 = tpu.memref_slice %arg3[%c2_i32_83, %c0_i32_84] : memref<8x32xf32, #tpu.memory_space<vmem>> -> memref<1x32xf32, #tpu.memory_space<vmem>>
      %158 = tpu.memref_slice %arg4[%c2_i32_81] : memref<32x!tpu.dma_semaphore, #tpu.memory_space<semaphore_mem>> -> memref<1x!tpu.dma_semaphore, #tpu.memory_space<semaphore_mem>>
      %159 = tpu.memref_squeeze %158 : memref<1x!tpu.dma_semaphore, #tpu.memory_space<semaphore_mem>> -> memref<!tpu.dma_semaphore, #tpu.memory_space<semaphore_mem>>
      tpu.enqueue_dma source(%156 : memref<1x32xf32, #tpu.memory_space<any>>) target(%157 : memref<1x32xf32, #tpu.memory_space<vmem>>) target_semaphore(%159 : memref<!tpu.dma_semaphore, #tpu.memory_space<semaphore_mem>>)
    } else {
    }
    %c3_i32 = arith.constant 3 : i32
    %13 = arith.addi %0, %c3_i32 : i32
    %c16_i32_5 = arith.constant 16 : i32
    %14 = arith.cmpi slt, %13, %c16_i32_5 : i32
    %15 = arith.extui %14 : i1 to i32
    %c0_i32_6 = arith.constant 0 : i32
    %16 = arith.cmpi ne, %15, %c0_i32_6 : i32
    scf.if %16 {
      %c3_i32_80 = arith.constant 3 : i32
      %153 = arith.addi %0, %c3_i32_80 : i32
      %154 = arith.index_cast %153 : i32 to index
      %155 = memref.load %arg1[%154] : memref<16xi32, #tpu.memory_space<smem>>
      %c3_i32_81 = arith.constant 3 : i32
      %c0_i32_82 = arith.constant 0 : i32
      %156 = tpu.memref_slice %arg2[%155, %c0_i32_82] : memref<32x32xf32, #tpu.memory_space<any>> -> memref<1x32xf32, #tpu.memory_space<any>>
      %c3_i32_83 = arith.constant 3 : i32
      %c0_i32_84 = arith.constant 0 : i32
      %157 = tpu.memref_slice %arg3[%c3_i32_83, %c0_i32_84] : memref<8x32xf32, #tpu.memory_space<vmem>> -> memref<1x32xf32, #tpu.memory_space<vmem>>
      %158 = tpu.memref_slice %arg4[%c3_i32_81] : memref<32x!tpu.dma_semaphore, #tpu.memory_space<semaphore_mem>> -> memref<1x!tpu.dma_semaphore, #tpu.memory_space<semaphore_mem>>
      %159 = tpu.memref_squeeze %158 : memref<1x!tpu.dma_semaphore, #tpu.memory_space<semaphore_mem>> -> memref<!tpu.dma_semaphore, #tpu.memory_space<semaphore_mem>>
      tpu.enqueue_dma source(%156 : memref<1x32xf32, #tpu.memory_space<any>>) target(%157 : memref<1x32xf32, #tpu.memory_space<vmem>>) target_semaphore(%159 : memref<!tpu.dma_semaphore, #tpu.memory_space<semaphore_mem>>)
    } else {
    }
    %c4_i32 = arith.constant 4 : i32
    %17 = arith.addi %0, %c4_i32 : i32
    %c16_i32_7 = arith.constant 16 : i32
    %18 = arith.cmpi slt, %17, %c16_i32_7 : i32
    %19 = arith.extui %18 : i1 to i32
    %c0_i32_8 = arith.constant 0 : i32
    %20 = arith.cmpi ne, %19, %c0_i32_8 : i32
    scf.if %20 {
      %c4_i32_80 = arith.constant 4 : i32
      %153 = arith.addi %0, %c4_i32_80 : i32
      %154 = arith.index_cast %153 : i32 to index
      %155 = memref.load %arg1[%154] : memref<16xi32, #tpu.memory_space<smem>>
      %c4_i32_81 = arith.constant 4 : i32
      %c0_i32_82 = arith.constant 0 : i32
      %156 = tpu.memref_slice %arg2[%155, %c0_i32_82] : memref<32x32xf32, #tpu.memory_space<any>> -> memref<1x32xf32, #tpu.memory_space<any>>
      %c4_i32_83 = arith.constant 4 : i32
      %c0_i32_84 = arith.constant 0 : i32
      %157 = tpu.memref_slice %arg3[%c4_i32_83, %c0_i32_84] : memref<8x32xf32, #tpu.memory_space<vmem>> -> memref<1x32xf32, #tpu.memory_space<vmem>>
      %158 = tpu.memref_slice %arg4[%c4_i32_81] : memref<32x!tpu.dma_semaphore, #tpu.memory_space<semaphore_mem>> -> memref<1x!tpu.dma_semaphore, #tpu.memory_space<semaphore_mem>>
      %159 = tpu.memref_squeeze %158 : memref<1x!tpu.dma_semaphore, #tpu.memory_space<semaphore_mem>> -> memref<!tpu.dma_semaphore, #tpu.memory_space<semaphore_mem>>
      tpu.enqueue_dma source(%156 : memref<1x32xf32, #tpu.memory_space<any>>) target(%157 : memref<1x32xf32, #tpu.memory_space<vmem>>) target_semaphore(%159 : memref<!tpu.dma_semaphore, #tpu.memory_space<semaphore_mem>>)
    } else {
    }
    %c5_i32 = arith.constant 5 : i32
    %21 = arith.addi %0, %c5_i32 : i32
    %c16_i32_9 = arith.constant 16 : i32
    %22 = arith.cmpi slt, %21, %c16_i32_9 : i32
    %23 = arith.extui %22 : i1 to i32
    %c0_i32_10 = arith.constant 0 : i32
    %24 = arith.cmpi ne, %23, %c0_i32_10 : i32
    scf.if %24 {
      %c5_i32_80 = arith.constant 5 : i32
      %153 = arith.addi %0, %c5_i32_80 : i32
      %154 = arith.index_cast %153 : i32 to index
      %155 = memref.load %arg1[%154] : memref<16xi32, #tpu.memory_space<smem>>
      %c5_i32_81 = arith.constant 5 : i32
      %c0_i32_82 = arith.constant 0 : i32
      %156 = tpu.memref_slice %arg2[%155, %c0_i32_82] : memref<32x32xf32, #tpu.memory_space<any>> -> memref<1x32xf32, #tpu.memory_space<any>>
      %c5_i32_83 = arith.constant 5 : i32
      %c0_i32_84 = arith.constant 0 : i32
      %157 = tpu.memref_slice %arg3[%c5_i32_83, %c0_i32_84] : memref<8x32xf32, #tpu.memory_space<vmem>> -> memref<1x32xf32, #tpu.memory_space<vmem>>
      %158 = tpu.memref_slice %arg4[%c5_i32_81] : memref<32x!tpu.dma_semaphore, #tpu.memory_space<semaphore_mem>> -> memref<1x!tpu.dma_semaphore, #tpu.memory_space<semaphore_mem>>
      %159 = tpu.memref_squeeze %158 : memref<1x!tpu.dma_semaphore, #tpu.memory_space<semaphore_mem>> -> memref<!tpu.dma_semaphore, #tpu.memory_space<semaphore_mem>>
      tpu.enqueue_dma source(%156 : memref<1x32xf32, #tpu.memory_space<any>>) target(%157 : memref<1x32xf32, #tpu.memory_space<vmem>>) target_semaphore(%159 : memref<!tpu.dma_semaphore, #tpu.memory_space<semaphore_mem>>)
    } else {
    }
    %c6_i32 = arith.constant 6 : i32
    %25 = arith.addi %0, %c6_i32 : i32
    %c16_i32_11 = arith.constant 16 : i32
    %26 = arith.cmpi slt, %25, %c16_i32_11 : i32
    %27 = arith.extui %26 : i1 to i32
    %c0_i32_12 = arith.constant 0 : i32
    %28 = arith.cmpi ne, %27, %c0_i32_12 : i32
    scf.if %28 {
      %c6_i32_80 = arith.constant 6 : i32
      %153 = arith.addi %0, %c6_i32_80 : i32
      %154 = arith.index_cast %153 : i32 to index
      %155 = memref.load %arg1[%154] : memref<16xi32, #tpu.memory_space<smem>>
      %c6_i32_81 = arith.constant 6 : i32
      %c0_i32_82 = arith.constant 0 : i32
      %156 = tpu.memref_slice %arg2[%155, %c0_i32_82] : memref<32x32xf32, #tpu.memory_space<any>> -> memref<1x32xf32, #tpu.memory_space<any>>
      %c6_i32_83 = arith.constant 6 : i32
      %c0_i32_84 = arith.constant 0 : i32
      %157 = tpu.memref_slice %arg3[%c6_i32_83, %c0_i32_84] : memref<8x32xf32, #tpu.memory_space<vmem>> -> memref<1x32xf32, #tpu.memory_space<vmem>>
      %158 = tpu.memref_slice %arg4[%c6_i32_81] : memref<32x!tpu.dma_semaphore, #tpu.memory_space<semaphore_mem>> -> memref<1x!tpu.dma_semaphore, #tpu.memory_space<semaphore_mem>>
      %159 = tpu.memref_squeeze %158 : memref<1x!tpu.dma_semaphore, #tpu.memory_space<semaphore_mem>> -> memref<!tpu.dma_semaphore, #tpu.memory_space<semaphore_mem>>
      tpu.enqueue_dma source(%156 : memref<1x32xf32, #tpu.memory_space<any>>) target(%157 : memref<1x32xf32, #tpu.memory_space<vmem>>) target_semaphore(%159 : memref<!tpu.dma_semaphore, #tpu.memory_space<semaphore_mem>>)
    } else {
    }
    %c7_i32 = arith.constant 7 : i32
    %29 = arith.addi %0, %c7_i32 : i32
    %c16_i32_13 = arith.constant 16 : i32
    %30 = arith.cmpi slt, %29, %c16_i32_13 : i32
    %31 = arith.extui %30 : i1 to i32
    %c0_i32_14 = arith.constant 0 : i32
    %32 = arith.cmpi ne, %31, %c0_i32_14 : i32
    scf.if %32 {
      %c7_i32_80 = arith.constant 7 : i32
      %153 = arith.addi %0, %c7_i32_80 : i32
      %154 = arith.index_cast %153 : i32 to index
      %155 = memref.load %arg1[%154] : memref<16xi32, #tpu.memory_space<smem>>
      %c7_i32_81 = arith.constant 7 : i32
      %c0_i32_82 = arith.constant 0 : i32
      %156 = tpu.memref_slice %arg2[%155, %c0_i32_82] : memref<32x32xf32, #tpu.memory_space<any>> -> memref<1x32xf32, #tpu.memory_space<any>>
      %c7_i32_83 = arith.constant 7 : i32
      %c0_i32_84 = arith.constant 0 : i32
      %157 = tpu.memref_slice %arg3[%c7_i32_83, %c0_i32_84] : memref<8x32xf32, #tpu.memory_space<vmem>> -> memref<1x32xf32, #tpu.memory_space<vmem>>
      %158 = tpu.memref_slice %arg4[%c7_i32_81] : memref<32x!tpu.dma_semaphore, #tpu.memory_space<semaphore_mem>> -> memref<1x!tpu.dma_semaphore, #tpu.memory_space<semaphore_mem>>
      %159 = tpu.memref_squeeze %158 : memref<1x!tpu.dma_semaphore, #tpu.memory_space<semaphore_mem>> -> memref<!tpu.dma_semaphore, #tpu.memory_space<semaphore_mem>>
      tpu.enqueue_dma source(%156 : memref<1x32xf32, #tpu.memory_space<any>>) target(%157 : memref<1x32xf32, #tpu.memory_space<vmem>>) target_semaphore(%159 : memref<!tpu.dma_semaphore, #tpu.memory_space<semaphore_mem>>)
    } else {
    }
    %c0_i32_15 = arith.constant 0 : i32
    %c8_i32_16 = arith.constant 8 : i32
    %33 = arith.addi %c0_i32_15, %c8_i32_16 : i32
    %c7_i32_17 = arith.constant 7 : i32
    %34 = arith.minsi %33, %c7_i32_17 : i32
    %35 = arith.addi %0, %34 : i32
    %36 = arith.index_cast %35 : i32 to index
    %37 = memref.load %arg1[%36] : memref<16xi32, #tpu.memory_space<smem>>
    %38 = arith.addi %0, %c0_i32_15 : i32
    %c16_i32_18 = arith.constant 16 : i32
    %39 = arith.cmpi slt, %38, %c16_i32_18 : i32
    %40 = arith.extui %39 : i1 to i32
    %c0_i32_19 = arith.constant 0 : i32
    %41 = arith.cmpi ne, %40, %c0_i32_19 : i32
    scf.if %41 {
      %c8_i32_80 = arith.constant 8 : i32
      %c0_i32_81 = arith.constant 0 : i32
      %153 = arith.cmpi eq, %c8_i32_80, %c0_i32_81 : i32
      %c1_i32_82 = arith.constant 1 : i32
      %154 = arith.select %153, %c1_i32_82, %c8_i32_80 : i32
      %155 = arith.remsi %c0_i32_15, %154 : i32
      %c0_i32_83 = arith.constant 0 : i32
      %156 = arith.cmpi ne, %155, %c0_i32_83 : i32
      %c0_i32_84 = arith.constant 0 : i32
      %157 = arith.cmpi slt, %155, %c0_i32_84 : i32
      %c0_i32_85 = arith.constant 0 : i32
      %158 = arith.cmpi slt, %154, %c0_i32_85 : i32
      %159 = arith.xori %157, %158 : i1
      %160 = arith.andi %159, %156 : i1
      %161 = arith.addi %155, %154 : i32
      %162 = arith.select %160, %161, %155 : i32
      %c0_i32_86 = arith.constant 0 : i32
      %c0_i32_87 = arith.constant 0 : i32
      %163 = tpu.memref_slice %arg2[%c0_i32_86, %c0_i32_87] : memref<32x32xf32, #tpu.memory_space<any>> -> memref<1x32xf32, #tpu.memory_space<any>>
      %c0_i32_88 = arith.constant 0 : i32
      %164 = tpu.memref_slice %arg3[%c0_i32_15, %c0_i32_88] : memref<8x32xf32, #tpu.memory_space<vmem>> -> memref<1x32xf32, #tpu.memory_space<vmem>>
      %165 = tpu.memref_slice %arg4[%162] : memref<32x!tpu.dma_semaphore, #tpu.memory_space<semaphore_mem>> -> memref<1x!tpu.dma_semaphore, #tpu.memory_space<semaphore_mem>>
      %166 = tpu.memref_squeeze %165 : memref<1x!tpu.dma_semaphore, #tpu.memory_space<semaphore_mem>> -> memref<!tpu.dma_semaphore, #tpu.memory_space<semaphore_mem>>
      tpu.wait_dma2 semaphore(%166 : memref<!tpu.dma_semaphore, #tpu.memory_space<semaphore_mem>>) src(%163 : memref<1x32xf32, #tpu.memory_space<any>>) dst(%164 : memref<1x32xf32, #tpu.memory_space<vmem>>)
    } else {
    }
    %c8_i32_20 = arith.constant 8 : i32
    %42 = arith.cmpi slt, %33, %c8_i32_20 : i32
    %43 = arith.addi %0, %33 : i32
    %c16_i32_21 = arith.constant 16 : i32
    %44 = arith.cmpi slt, %43, %c16_i32_21 : i32
    %45 = arith.andi %42, %44 : i1
    %46 = arith.extui %45 : i1 to i32
    %c0_i32_22 = arith.constant 0 : i32
    %47 = arith.cmpi ne, %46, %c0_i32_22 : i32
    scf.if %47 {
      %c8_i32_80 = arith.constant 8 : i32
      %c0_i32_81 = arith.constant 0 : i32
      %153 = arith.cmpi eq, %c8_i32_80, %c0_i32_81 : i32
      %c1_i32_82 = arith.constant 1 : i32
      %154 = arith.select %153, %c1_i32_82, %c8_i32_80 : i32
      %155 = arith.remsi %33, %154 : i32
      %c0_i32_83 = arith.constant 0 : i32
      %156 = arith.cmpi ne, %155, %c0_i32_83 : i32
      %c0_i32_84 = arith.constant 0 : i32
      %157 = arith.cmpi slt, %155, %c0_i32_84 : i32
      %c0_i32_85 = arith.constant 0 : i32
      %158 = arith.cmpi slt, %154, %c0_i32_85 : i32
      %159 = arith.xori %157, %158 : i1
      %160 = arith.andi %159, %156 : i1
      %161 = arith.addi %155, %154 : i32
      %162 = arith.select %160, %161, %155 : i32
      %c0_i32_86 = arith.constant 0 : i32
      %163 = tpu.memref_slice %arg2[%37, %c0_i32_86] : memref<32x32xf32, #tpu.memory_space<any>> -> memref<1x32xf32, #tpu.memory_space<any>>
      %c0_i32_87 = arith.constant 0 : i32
      %164 = tpu.memref_slice %arg3[%33, %c0_i32_87] : memref<8x32xf32, #tpu.memory_space<vmem>> -> memref<1x32xf32, #tpu.memory_space<vmem>>
      %165 = tpu.memref_slice %arg4[%162] : memref<32x!tpu.dma_semaphore, #tpu.memory_space<semaphore_mem>> -> memref<1x!tpu.dma_semaphore, #tpu.memory_space<semaphore_mem>>
      %166 = tpu.memref_squeeze %165 : memref<1x!tpu.dma_semaphore, #tpu.memory_space<semaphore_mem>> -> memref<!tpu.dma_semaphore, #tpu.memory_space<semaphore_mem>>
      tpu.enqueue_dma source(%163 : memref<1x32xf32, #tpu.memory_space<any>>) target(%164 : memref<1x32xf32, #tpu.memory_space<vmem>>) target_semaphore(%166 : memref<!tpu.dma_semaphore, #tpu.memory_space<semaphore_mem>>)
    } else {
    }
    %c1_i32_23 = arith.constant 1 : i32
    %c8_i32_24 = arith.constant 8 : i32
    %48 = arith.addi %c1_i32_23, %c8_i32_24 : i32
    %c7_i32_25 = arith.constant 7 : i32
    %49 = arith.minsi %48, %c7_i32_25 : i32
    %50 = arith.addi %0, %49 : i32
    %51 = arith.index_cast %50 : i32 to index
    %52 = memref.load %arg1[%51] : memref<16xi32, #tpu.memory_space<smem>>
    %53 = arith.addi %0, %c1_i32_23 : i32
    %c16_i32_26 = arith.constant 16 : i32
    %54 = arith.cmpi slt, %53, %c16_i32_26 : i32
    %55 = arith.extui %54 : i1 to i32
    %c0_i32_27 = arith.constant 0 : i32
    %56 = arith.cmpi ne, %55, %c0_i32_27 : i32
    scf.if %56 {
      %c8_i32_80 = arith.constant 8 : i32
      %c0_i32_81 = arith.constant 0 : i32
      %153 = arith.cmpi eq, %c8_i32_80, %c0_i32_81 : i32
      %c1_i32_82 = arith.constant 1 : i32
      %154 = arith.select %153, %c1_i32_82, %c8_i32_80 : i32
      %155 = arith.remsi %c1_i32_23, %154 : i32
      %c0_i32_83 = arith.constant 0 : i32
      %156 = arith.cmpi ne, %155, %c0_i32_83 : i32
      %c0_i32_84 = arith.constant 0 : i32
      %157 = arith.cmpi slt, %155, %c0_i32_84 : i32
      %c0_i32_85 = arith.constant 0 : i32
      %158 = arith.cmpi slt, %154, %c0_i32_85 : i32
      %159 = arith.xori %157, %158 : i1
      %160 = arith.andi %159, %156 : i1
      %161 = arith.addi %155, %154 : i32
      %162 = arith.select %160, %161, %155 : i32
      %c0_i32_86 = arith.constant 0 : i32
      %c0_i32_87 = arith.constant 0 : i32
      %163 = tpu.memref_slice %arg2[%c0_i32_86, %c0_i32_87] : memref<32x32xf32, #tpu.memory_space<any>> -> memref<1x32xf32, #tpu.memory_space<any>>
      %c0_i32_88 = arith.constant 0 : i32
      %164 = tpu.memref_slice %arg3[%c1_i32_23, %c0_i32_88] : memref<8x32xf32, #tpu.memory_space<vmem>> -> memref<1x32xf32, #tpu.memory_space<vmem>>
      %165 = tpu.memref_slice %arg4[%162] : memref<32x!tpu.dma_semaphore, #tpu.memory_space<semaphore_mem>> -> memref<1x!tpu.dma_semaphore, #tpu.memory_space<semaphore_mem>>
      %166 = tpu.memref_squeeze %165 : memref<1x!tpu.dma_semaphore, #tpu.memory_space<semaphore_mem>> -> memref<!tpu.dma_semaphore, #tpu.memory_space<semaphore_mem>>
      tpu.wait_dma2 semaphore(%166 : memref<!tpu.dma_semaphore, #tpu.memory_space<semaphore_mem>>) src(%163 : memref<1x32xf32, #tpu.memory_space<any>>) dst(%164 : memref<1x32xf32, #tpu.memory_space<vmem>>)
    } else {
    }
    %c8_i32_28 = arith.constant 8 : i32
    %57 = arith.cmpi slt, %48, %c8_i32_28 : i32
    %58 = arith.addi %0, %48 : i32
    %c16_i32_29 = arith.constant 16 : i32
    %59 = arith.cmpi slt, %58, %c16_i32_29 : i32
    %60 = arith.andi %57, %59 : i1
    %61 = arith.extui %60 : i1 to i32
    %c0_i32_30 = arith.constant 0 : i32
    %62 = arith.cmpi ne, %61, %c0_i32_30 : i32
    scf.if %62 {
      %c8_i32_80 = arith.constant 8 : i32
      %c0_i32_81 = arith.constant 0 : i32
      %153 = arith.cmpi eq, %c8_i32_80, %c0_i32_81 : i32
      %c1_i32_82 = arith.constant 1 : i32
      %154 = arith.select %153, %c1_i32_82, %c8_i32_80 : i32
      %155 = arith.remsi %48, %154 : i32
      %c0_i32_83 = arith.constant 0 : i32
      %156 = arith.cmpi ne, %155, %c0_i32_83 : i32
      %c0_i32_84 = arith.constant 0 : i32
      %157 = arith.cmpi slt, %155, %c0_i32_84 : i32
      %c0_i32_85 = arith.constant 0 : i32
      %158 = arith.cmpi slt, %154, %c0_i32_85 : i32
      %159 = arith.xori %157, %158 : i1
      %160 = arith.andi %159, %156 : i1
      %161 = arith.addi %155, %154 : i32
      %162 = arith.select %160, %161, %155 : i32
      %c0_i32_86 = arith.constant 0 : i32
      %163 = tpu.memref_slice %arg2[%52, %c0_i32_86] : memref<32x32xf32, #tpu.memory_space<any>> -> memref<1x32xf32, #tpu.memory_space<any>>
      %c0_i32_87 = arith.constant 0 : i32
      %164 = tpu.memref_slice %arg3[%48, %c0_i32_87] : memref<8x32xf32, #tpu.memory_space<vmem>> -> memref<1x32xf32, #tpu.memory_space<vmem>>
      %165 = tpu.memref_slice %arg4[%162] : memref<32x!tpu.dma_semaphore, #tpu.memory_space<semaphore_mem>> -> memref<1x!tpu.dma_semaphore, #tpu.memory_space<semaphore_mem>>
      %166 = tpu.memref_squeeze %165 : memref<1x!tpu.dma_semaphore, #tpu.memory_space<semaphore_mem>> -> memref<!tpu.dma_semaphore, #tpu.memory_space<semaphore_mem>>
      tpu.enqueue_dma source(%163 : memref<1x32xf32, #tpu.memory_space<any>>) target(%164 : memref<1x32xf32, #tpu.memory_space<vmem>>) target_semaphore(%166 : memref<!tpu.dma_semaphore, #tpu.memory_space<semaphore_mem>>)
    } else {
    }
    %c2_i32_31 = arith.constant 2 : i32
    %c8_i32_32 = arith.constant 8 : i32
    %63 = arith.addi %c2_i32_31, %c8_i32_32 : i32
    %c7_i32_33 = arith.constant 7 : i32
    %64 = arith.minsi %63, %c7_i32_33 : i32
    %65 = arith.addi %0, %64 : i32
    %66 = arith.index_cast %65 : i32 to index
    %67 = memref.load %arg1[%66] : memref<16xi32, #tpu.memory_space<smem>>
    %68 = arith.addi %0, %c2_i32_31 : i32
    %c16_i32_34 = arith.constant 16 : i32
    %69 = arith.cmpi slt, %68, %c16_i32_34 : i32
    %70 = arith.extui %69 : i1 to i32
    %c0_i32_35 = arith.constant 0 : i32
    %71 = arith.cmpi ne, %70, %c0_i32_35 : i32
    scf.if %71 {
      %c8_i32_80 = arith.constant 8 : i32
      %c0_i32_81 = arith.constant 0 : i32
      %153 = arith.cmpi eq, %c8_i32_80, %c0_i32_81 : i32
      %c1_i32_82 = arith.constant 1 : i32
      %154 = arith.select %153, %c1_i32_82, %c8_i32_80 : i32
      %155 = arith.remsi %c2_i32_31, %154 : i32
      %c0_i32_83 = arith.constant 0 : i32
      %156 = arith.cmpi ne, %155, %c0_i32_83 : i32
      %c0_i32_84 = arith.constant 0 : i32
      %157 = arith.cmpi slt, %155, %c0_i32_84 : i32
      %c0_i32_85 = arith.constant 0 : i32
      %158 = arith.cmpi slt, %154, %c0_i32_85 : i32
      %159 = arith.xori %157, %158 : i1
      %160 = arith.andi %159, %156 : i1
      %161 = arith.addi %155, %154 : i32
      %162 = arith.select %160, %161, %155 : i32
      %c0_i32_86 = arith.constant 0 : i32
      %c0_i32_87 = arith.constant 0 : i32
      %163 = tpu.memref_slice %arg2[%c0_i32_86, %c0_i32_87] : memref<32x32xf32, #tpu.memory_space<any>> -> memref<1x32xf32, #tpu.memory_space<any>>
      %c0_i32_88 = arith.constant 0 : i32
      %164 = tpu.memref_slice %arg3[%c2_i32_31, %c0_i32_88] : memref<8x32xf32, #tpu.memory_space<vmem>> -> memref<1x32xf32, #tpu.memory_space<vmem>>
      %165 = tpu.memref_slice %arg4[%162] : memref<32x!tpu.dma_semaphore, #tpu.memory_space<semaphore_mem>> -> memref<1x!tpu.dma_semaphore, #tpu.memory_space<semaphore_mem>>
      %166 = tpu.memref_squeeze %165 : memref<1x!tpu.dma_semaphore, #tpu.memory_space<semaphore_mem>> -> memref<!tpu.dma_semaphore, #tpu.memory_space<semaphore_mem>>
      tpu.wait_dma2 semaphore(%166 : memref<!tpu.dma_semaphore, #tpu.memory_space<semaphore_mem>>) src(%163 : memref<1x32xf32, #tpu.memory_space<any>>) dst(%164 : memref<1x32xf32, #tpu.memory_space<vmem>>)
    } else {
    }
    %c8_i32_36 = arith.constant 8 : i32
    %72 = arith.cmpi slt, %63, %c8_i32_36 : i32
    %73 = arith.addi %0, %63 : i32
    %c16_i32_37 = arith.constant 16 : i32
    %74 = arith.cmpi slt, %73, %c16_i32_37 : i32
    %75 = arith.andi %72, %74 : i1
    %76 = arith.extui %75 : i1 to i32
    %c0_i32_38 = arith.constant 0 : i32
    %77 = arith.cmpi ne, %76, %c0_i32_38 : i32
    scf.if %77 {
      %c8_i32_80 = arith.constant 8 : i32
      %c0_i32_81 = arith.constant 0 : i32
      %153 = arith.cmpi eq, %c8_i32_80, %c0_i32_81 : i32
      %c1_i32_82 = arith.constant 1 : i32
      %154 = arith.select %153, %c1_i32_82, %c8_i32_80 : i32
      %155 = arith.remsi %63, %154 : i32
      %c0_i32_83 = arith.constant 0 : i32
      %156 = arith.cmpi ne, %155, %c0_i32_83 : i32
      %c0_i32_84 = arith.constant 0 : i32
      %157 = arith.cmpi slt, %155, %c0_i32_84 : i32
      %c0_i32_85 = arith.constant 0 : i32
      %158 = arith.cmpi slt, %154, %c0_i32_85 : i32
      %159 = arith.xori %157, %158 : i1
      %160 = arith.andi %159, %156 : i1
      %161 = arith.addi %155, %154 : i32
      %162 = arith.select %160, %161, %155 : i32
      %c0_i32_86 = arith.constant 0 : i32
      %163 = tpu.memref_slice %arg2[%67, %c0_i32_86] : memref<32x32xf32, #tpu.memory_space<any>> -> memref<1x32xf32, #tpu.memory_space<any>>
      %c0_i32_87 = arith.constant 0 : i32
      %164 = tpu.memref_slice %arg3[%63, %c0_i32_87] : memref<8x32xf32, #tpu.memory_space<vmem>> -> memref<1x32xf32, #tpu.memory_space<vmem>>
      %165 = tpu.memref_slice %arg4[%162] : memref<32x!tpu.dma_semaphore, #tpu.memory_space<semaphore_mem>> -> memref<1x!tpu.dma_semaphore, #tpu.memory_space<semaphore_mem>>
      %166 = tpu.memref_squeeze %165 : memref<1x!tpu.dma_semaphore, #tpu.memory_space<semaphore_mem>> -> memref<!tpu.dma_semaphore, #tpu.memory_space<semaphore_mem>>
      tpu.enqueue_dma source(%163 : memref<1x32xf32, #tpu.memory_space<any>>) target(%164 : memref<1x32xf32, #tpu.memory_space<vmem>>) target_semaphore(%166 : memref<!tpu.dma_semaphore, #tpu.memory_space<semaphore_mem>>)
    } else {
    }
    %c3_i32_39 = arith.constant 3 : i32
    %c8_i32_40 = arith.constant 8 : i32
    %78 = arith.addi %c3_i32_39, %c8_i32_40 : i32
    %c7_i32_41 = arith.constant 7 : i32
    %79 = arith.minsi %78, %c7_i32_41 : i32
    %80 = arith.addi %0, %79 : i32
    %81 = arith.index_cast %80 : i32 to index
    %82 = memref.load %arg1[%81] : memref<16xi32, #tpu.memory_space<smem>>
    %83 = arith.addi %0, %c3_i32_39 : i32
    %c16_i32_42 = arith.constant 16 : i32
    %84 = arith.cmpi slt, %83, %c16_i32_42 : i32
    %85 = arith.extui %84 : i1 to i32
    %c0_i32_43 = arith.constant 0 : i32
    %86 = arith.cmpi ne, %85, %c0_i32_43 : i32
    scf.if %86 {
      %c8_i32_80 = arith.constant 8 : i32
      %c0_i32_81 = arith.constant 0 : i32
      %153 = arith.cmpi eq, %c8_i32_80, %c0_i32_81 : i32
      %c1_i32_82 = arith.constant 1 : i32
      %154 = arith.select %153, %c1_i32_82, %c8_i32_80 : i32
      %155 = arith.remsi %c3_i32_39, %154 : i32
      %c0_i32_83 = arith.constant 0 : i32
      %156 = arith.cmpi ne, %155, %c0_i32_83 : i32
      %c0_i32_84 = arith.constant 0 : i32
      %157 = arith.cmpi slt, %155, %c0_i32_84 : i32
      %c0_i32_85 = arith.constant 0 : i32
      %158 = arith.cmpi slt, %154, %c0_i32_85 : i32
      %159 = arith.xori %157, %158 : i1
      %160 = arith.andi %159, %156 : i1
      %161 = arith.addi %155, %154 : i32
      %162 = arith.select %160, %161, %155 : i32
      %c0_i32_86 = arith.constant 0 : i32
      %c0_i32_87 = arith.constant 0 : i32
      %163 = tpu.memref_slice %arg2[%c0_i32_86, %c0_i32_87] : memref<32x32xf32, #tpu.memory_space<any>> -> memref<1x32xf32, #tpu.memory_space<any>>
      %c0_i32_88 = arith.constant 0 : i32
      %164 = tpu.memref_slice %arg3[%c3_i32_39, %c0_i32_88] : memref<8x32xf32, #tpu.memory_space<vmem>> -> memref<1x32xf32, #tpu.memory_space<vmem>>
      %165 = tpu.memref_slice %arg4[%162] : memref<32x!tpu.dma_semaphore, #tpu.memory_space<semaphore_mem>> -> memref<1x!tpu.dma_semaphore, #tpu.memory_space<semaphore_mem>>
      %166 = tpu.memref_squeeze %165 : memref<1x!tpu.dma_semaphore, #tpu.memory_space<semaphore_mem>> -> memref<!tpu.dma_semaphore, #tpu.memory_space<semaphore_mem>>
      tpu.wait_dma2 semaphore(%166 : memref<!tpu.dma_semaphore, #tpu.memory_space<semaphore_mem>>) src(%163 : memref<1x32xf32, #tpu.memory_space<any>>) dst(%164 : memref<1x32xf32, #tpu.memory_space<vmem>>)
    } else {
    }
    %c8_i32_44 = arith.constant 8 : i32
    %87 = arith.cmpi slt, %78, %c8_i32_44 : i32
    %88 = arith.addi %0, %78 : i32
    %c16_i32_45 = arith.constant 16 : i32
    %89 = arith.cmpi slt, %88, %c16_i32_45 : i32
    %90 = arith.andi %87, %89 : i1
    %91 = arith.extui %90 : i1 to i32
    %c0_i32_46 = arith.constant 0 : i32
    %92 = arith.cmpi ne, %91, %c0_i32_46 : i32
    scf.if %92 {
      %c8_i32_80 = arith.constant 8 : i32
      %c0_i32_81 = arith.constant 0 : i32
      %153 = arith.cmpi eq, %c8_i32_80, %c0_i32_81 : i32
      %c1_i32_82 = arith.constant 1 : i32
      %154 = arith.select %153, %c1_i32_82, %c8_i32_80 : i32
      %155 = arith.remsi %78, %154 : i32
      %c0_i32_83 = arith.constant 0 : i32
      %156 = arith.cmpi ne, %155, %c0_i32_83 : i32
      %c0_i32_84 = arith.constant 0 : i32
      %157 = arith.cmpi slt, %155, %c0_i32_84 : i32
      %c0_i32_85 = arith.constant 0 : i32
      %158 = arith.cmpi slt, %154, %c0_i32_85 : i32
      %159 = arith.xori %157, %158 : i1
      %160 = arith.andi %159, %156 : i1
      %161 = arith.addi %155, %154 : i32
      %162 = arith.select %160, %161, %155 : i32
      %c0_i32_86 = arith.constant 0 : i32
      %163 = tpu.memref_slice %arg2[%82, %c0_i32_86] : memref<32x32xf32, #tpu.memory_space<any>> -> memref<1x32xf32, #tpu.memory_space<any>>
      %c0_i32_87 = arith.constant 0 : i32
      %164 = tpu.memref_slice %arg3[%78, %c0_i32_87] : memref<8x32xf32, #tpu.memory_space<vmem>> -> memref<1x32xf32, #tpu.memory_space<vmem>>
      %165 = tpu.memref_slice %arg4[%162] : memref<32x!tpu.dma_semaphore, #tpu.memory_space<semaphore_mem>> -> memref<1x!tpu.dma_semaphore, #tpu.memory_space<semaphore_mem>>
      %166 = tpu.memref_squeeze %165 : memref<1x!tpu.dma_semaphore, #tpu.memory_space<semaphore_mem>> -> memref<!tpu.dma_semaphore, #tpu.memory_space<semaphore_mem>>
      tpu.enqueue_dma source(%163 : memref<1x32xf32, #tpu.memory_space<any>>) target(%164 : memref<1x32xf32, #tpu.memory_space<vmem>>) target_semaphore(%166 : memref<!tpu.dma_semaphore, #tpu.memory_space<semaphore_mem>>)
    } else {
    }
    %c4_i32_47 = arith.constant 4 : i32
    %c8_i32_48 = arith.constant 8 : i32
    %93 = arith.addi %c4_i32_47, %c8_i32_48 : i32
    %c7_i32_49 = arith.constant 7 : i32
    %94 = arith.minsi %93, %c7_i32_49 : i32
    %95 = arith.addi %0, %94 : i32
    %96 = arith.index_cast %95 : i32 to index
    %97 = memref.load %arg1[%96] : memref<16xi32, #tpu.memory_space<smem>>
    %98 = arith.addi %0, %c4_i32_47 : i32
    %c16_i32_50 = arith.constant 16 : i32
    %99 = arith.cmpi slt, %98, %c16_i32_50 : i32
    %100 = arith.extui %99 : i1 to i32
    %c0_i32_51 = arith.constant 0 : i32
    %101 = arith.cmpi ne, %100, %c0_i32_51 : i32
    scf.if %101 {
      %c8_i32_80 = arith.constant 8 : i32
      %c0_i32_81 = arith.constant 0 : i32
      %153 = arith.cmpi eq, %c8_i32_80, %c0_i32_81 : i32
      %c1_i32_82 = arith.constant 1 : i32
      %154 = arith.select %153, %c1_i32_82, %c8_i32_80 : i32
      %155 = arith.remsi %c4_i32_47, %154 : i32
      %c0_i32_83 = arith.constant 0 : i32
      %156 = arith.cmpi ne, %155, %c0_i32_83 : i32
      %c0_i32_84 = arith.constant 0 : i32
      %157 = arith.cmpi slt, %155, %c0_i32_84 : i32
      %c0_i32_85 = arith.constant 0 : i32
      %158 = arith.cmpi slt, %154, %c0_i32_85 : i32
      %159 = arith.xori %157, %158 : i1
      %160 = arith.andi %159, %156 : i1
      %161 = arith.addi %155, %154 : i32
      %162 = arith.select %160, %161, %155 : i32
      %c0_i32_86 = arith.constant 0 : i32
      %c0_i32_87 = arith.constant 0 : i32
      %163 = tpu.memref_slice %arg2[%c0_i32_86, %c0_i32_87] : memref<32x32xf32, #tpu.memory_space<any>> -> memref<1x32xf32, #tpu.memory_space<any>>
      %c0_i32_88 = arith.constant 0 : i32
      %164 = tpu.memref_slice %arg3[%c4_i32_47, %c0_i32_88] : memref<8x32xf32, #tpu.memory_space<vmem>> -> memref<1x32xf32, #tpu.memory_space<vmem>>
      %165 = tpu.memref_slice %arg4[%162] : memref<32x!tpu.dma_semaphore, #tpu.memory_space<semaphore_mem>> -> memref<1x!tpu.dma_semaphore, #tpu.memory_space<semaphore_mem>>
      %166 = tpu.memref_squeeze %165 : memref<1x!tpu.dma_semaphore, #tpu.memory_space<semaphore_mem>> -> memref<!tpu.dma_semaphore, #tpu.memory_space<semaphore_mem>>
      tpu.wait_dma2 semaphore(%166 : memref<!tpu.dma_semaphore, #tpu.memory_space<semaphore_mem>>) src(%163 : memref<1x32xf32, #tpu.memory_space<any>>) dst(%164 : memref<1x32xf32, #tpu.memory_space<vmem>>)
    } else {
    }
    %c8_i32_52 = arith.constant 8 : i32
    %102 = arith.cmpi slt, %93, %c8_i32_52 : i32
    %103 = arith.addi %0, %93 : i32
    %c16_i32_53 = arith.constant 16 : i32
    %104 = arith.cmpi slt, %103, %c16_i32_53 : i32
    %105 = arith.andi %102, %104 : i1
    %106 = arith.extui %105 : i1 to i32
    %c0_i32_54 = arith.constant 0 : i32
    %107 = arith.cmpi ne, %106, %c0_i32_54 : i32
    scf.if %107 {
      %c8_i32_80 = arith.constant 8 : i32
      %c0_i32_81 = arith.constant 0 : i32
      %153 = arith.cmpi eq, %c8_i32_80, %c0_i32_81 : i32
      %c1_i32_82 = arith.constant 1 : i32
      %154 = arith.select %153, %c1_i32_82, %c8_i32_80 : i32
      %155 = arith.remsi %93, %154 : i32
      %c0_i32_83 = arith.constant 0 : i32
      %156 = arith.cmpi ne, %155, %c0_i32_83 : i32
      %c0_i32_84 = arith.constant 0 : i32
      %157 = arith.cmpi slt, %155, %c0_i32_84 : i32
      %c0_i32_85 = arith.constant 0 : i32
      %158 = arith.cmpi slt, %154, %c0_i32_85 : i32
      %159 = arith.xori %157, %158 : i1
      %160 = arith.andi %159, %156 : i1
      %161 = arith.addi %155, %154 : i32
      %162 = arith.select %160, %161, %155 : i32
      %c0_i32_86 = arith.constant 0 : i32
      %163 = tpu.memref_slice %arg2[%97, %c0_i32_86] : memref<32x32xf32, #tpu.memory_space<any>> -> memref<1x32xf32, #tpu.memory_space<any>>
      %c0_i32_87 = arith.constant 0 : i32
      %164 = tpu.memref_slice %arg3[%93, %c0_i32_87] : memref<8x32xf32, #tpu.memory_space<vmem>> -> memref<1x32xf32, #tpu.memory_space<vmem>>
      %165 = tpu.memref_slice %arg4[%162] : memref<32x!tpu.dma_semaphore, #tpu.memory_space<semaphore_mem>> -> memref<1x!tpu.dma_semaphore, #tpu.memory_space<semaphore_mem>>
      %166 = tpu.memref_squeeze %165 : memref<1x!tpu.dma_semaphore, #tpu.memory_space<semaphore_mem>> -> memref<!tpu.dma_semaphore, #tpu.memory_space<semaphore_mem>>
      tpu.enqueue_dma source(%163 : memref<1x32xf32, #tpu.memory_space<any>>) target(%164 : memref<1x32xf32, #tpu.memory_space<vmem>>) target_semaphore(%166 : memref<!tpu.dma_semaphore, #tpu.memory_space<semaphore_mem>>)
    } else {
    }
    %c5_i32_55 = arith.constant 5 : i32
    %c8_i32_56 = arith.constant 8 : i32
    %108 = arith.addi %c5_i32_55, %c8_i32_56 : i32
    %c7_i32_57 = arith.constant 7 : i32
    %109 = arith.minsi %108, %c7_i32_57 : i32
    %110 = arith.addi %0, %109 : i32
    %111 = arith.index_cast %110 : i32 to index
    %112 = memref.load %arg1[%111] : memref<16xi32, #tpu.memory_space<smem>>
    %113 = arith.addi %0, %c5_i32_55 : i32
    %c16_i32_58 = arith.constant 16 : i32
    %114 = arith.cmpi slt, %113, %c16_i32_58 : i32
    %115 = arith.extui %114 : i1 to i32
    %c0_i32_59 = arith.constant 0 : i32
    %116 = arith.cmpi ne, %115, %c0_i32_59 : i32
    scf.if %116 {
      %c8_i32_80 = arith.constant 8 : i32
      %c0_i32_81 = arith.constant 0 : i32
      %153 = arith.cmpi eq, %c8_i32_80, %c0_i32_81 : i32
      %c1_i32_82 = arith.constant 1 : i32
      %154 = arith.select %153, %c1_i32_82, %c8_i32_80 : i32
      %155 = arith.remsi %c5_i32_55, %154 : i32
      %c0_i32_83 = arith.constant 0 : i32
      %156 = arith.cmpi ne, %155, %c0_i32_83 : i32
      %c0_i32_84 = arith.constant 0 : i32
      %157 = arith.cmpi slt, %155, %c0_i32_84 : i32
      %c0_i32_85 = arith.constant 0 : i32
      %158 = arith.cmpi slt, %154, %c0_i32_85 : i32
      %159 = arith.xori %157, %158 : i1
      %160 = arith.andi %159, %156 : i1
      %161 = arith.addi %155, %154 : i32
      %162 = arith.select %160, %161, %155 : i32
      %c0_i32_86 = arith.constant 0 : i32
      %c0_i32_87 = arith.constant 0 : i32
      %163 = tpu.memref_slice %arg2[%c0_i32_86, %c0_i32_87] : memref<32x32xf32, #tpu.memory_space<any>> -> memref<1x32xf32, #tpu.memory_space<any>>
      %c0_i32_88 = arith.constant 0 : i32
      %164 = tpu.memref_slice %arg3[%c5_i32_55, %c0_i32_88] : memref<8x32xf32, #tpu.memory_space<vmem>> -> memref<1x32xf32, #tpu.memory_space<vmem>>
      %165 = tpu.memref_slice %arg4[%162] : memref<32x!tpu.dma_semaphore, #tpu.memory_space<semaphore_mem>> -> memref<1x!tpu.dma_semaphore, #tpu.memory_space<semaphore_mem>>
      %166 = tpu.memref_squeeze %165 : memref<1x!tpu.dma_semaphore, #tpu.memory_space<semaphore_mem>> -> memref<!tpu.dma_semaphore, #tpu.memory_space<semaphore_mem>>
      tpu.wait_dma2 semaphore(%166 : memref<!tpu.dma_semaphore, #tpu.memory_space<semaphore_mem>>) src(%163 : memref<1x32xf32, #tpu.memory_space<any>>) dst(%164 : memref<1x32xf32, #tpu.memory_space<vmem>>)
    } else {
    }
    %c8_i32_60 = arith.constant 8 : i32
    %117 = arith.cmpi slt, %108, %c8_i32_60 : i32
    %118 = arith.addi %0, %108 : i32
    %c16_i32_61 = arith.constant 16 : i32
    %119 = arith.cmpi slt, %118, %c16_i32_61 : i32
    %120 = arith.andi %117, %119 : i1
    %121 = arith.extui %120 : i1 to i32
    %c0_i32_62 = arith.constant 0 : i32
    %122 = arith.cmpi ne, %121, %c0_i32_62 : i32
    scf.if %122 {
      %c8_i32_80 = arith.constant 8 : i32
      %c0_i32_81 = arith.constant 0 : i32
      %153 = arith.cmpi eq, %c8_i32_80, %c0_i32_81 : i32
      %c1_i32_82 = arith.constant 1 : i32
      %154 = arith.select %153, %c1_i32_82, %c8_i32_80 : i32
      %155 = arith.remsi %108, %154 : i32
      %c0_i32_83 = arith.constant 0 : i32
      %156 = arith.cmpi ne, %155, %c0_i32_83 : i32
      %c0_i32_84 = arith.constant 0 : i32
      %157 = arith.cmpi slt, %155, %c0_i32_84 : i32
      %c0_i32_85 = arith.constant 0 : i32
      %158 = arith.cmpi slt, %154, %c0_i32_85 : i32
      %159 = arith.xori %157, %158 : i1
      %160 = arith.andi %159, %156 : i1
      %161 = arith.addi %155, %154 : i32
      %162 = arith.select %160, %161, %155 : i32
      %c0_i32_86 = arith.constant 0 : i32
      %163 = tpu.memref_slice %arg2[%112, %c0_i32_86] : memref<32x32xf32, #tpu.memory_space<any>> -> memref<1x32xf32, #tpu.memory_space<any>>
      %c0_i32_87 = arith.constant 0 : i32
      %164 = tpu.memref_slice %arg3[%108, %c0_i32_87] : memref<8x32xf32, #tpu.memory_space<vmem>> -> memref<1x32xf32, #tpu.memory_space<vmem>>
      %165 = tpu.memref_slice %arg4[%162] : memref<32x!tpu.dma_semaphore, #tpu.memory_space<semaphore_mem>> -> memref<1x!tpu.dma_semaphore, #tpu.memory_space<semaphore_mem>>
      %166 = tpu.memref_squeeze %165 : memref<1x!tpu.dma_semaphore, #tpu.memory_space<semaphore_mem>> -> memref<!tpu.dma_semaphore, #tpu.memory_space<semaphore_mem>>
      tpu.enqueue_dma source(%163 : memref<1x32xf32, #tpu.memory_space<any>>) target(%164 : memref<1x32xf32, #tpu.memory_space<vmem>>) target_semaphore(%166 : memref<!tpu.dma_semaphore, #tpu.memory_space<semaphore_mem>>)
    } else {
    }
    %c6_i32_63 = arith.constant 6 : i32
    %c8_i32_64 = arith.constant 8 : i32
    %123 = arith.addi %c6_i32_63, %c8_i32_64 : i32
    %c7_i32_65 = arith.constant 7 : i32
    %124 = arith.minsi %123, %c7_i32_65 : i32
    %125 = arith.addi %0, %124 : i32
    %126 = arith.index_cast %125 : i32 to index
    %127 = memref.load %arg1[%126] : memref<16xi32, #tpu.memory_space<smem>>
    %128 = arith.addi %0, %c6_i32_63 : i32
    %c16_i32_66 = arith.constant 16 : i32
    %129 = arith.cmpi slt, %128, %c16_i32_66 : i32
    %130 = arith.extui %129 : i1 to i32
    %c0_i32_67 = arith.constant 0 : i32
    %131 = arith.cmpi ne, %130, %c0_i32_67 : i32
    scf.if %131 {
      %c8_i32_80 = arith.constant 8 : i32
      %c0_i32_81 = arith.constant 0 : i32
      %153 = arith.cmpi eq, %c8_i32_80, %c0_i32_81 : i32
      %c1_i32_82 = arith.constant 1 : i32
      %154 = arith.select %153, %c1_i32_82, %c8_i32_80 : i32
      %155 = arith.remsi %c6_i32_63, %154 : i32
      %c0_i32_83 = arith.constant 0 : i32
      %156 = arith.cmpi ne, %155, %c0_i32_83 : i32
      %c0_i32_84 = arith.constant 0 : i32
      %157 = arith.cmpi slt, %155, %c0_i32_84 : i32
      %c0_i32_85 = arith.constant 0 : i32
      %158 = arith.cmpi slt, %154, %c0_i32_85 : i32
      %159 = arith.xori %157, %158 : i1
      %160 = arith.andi %159, %156 : i1
      %161 = arith.addi %155, %154 : i32
      %162 = arith.select %160, %161, %155 : i32
      %c0_i32_86 = arith.constant 0 : i32
      %c0_i32_87 = arith.constant 0 : i32
      %163 = tpu.memref_slice %arg2[%c0_i32_86, %c0_i32_87] : memref<32x32xf32, #tpu.memory_space<any>> -> memref<1x32xf32, #tpu.memory_space<any>>
      %c0_i32_88 = arith.constant 0 : i32
      %164 = tpu.memref_slice %arg3[%c6_i32_63, %c0_i32_88] : memref<8x32xf32, #tpu.memory_space<vmem>> -> memref<1x32xf32, #tpu.memory_space<vmem>>
      %165 = tpu.memref_slice %arg4[%162] : memref<32x!tpu.dma_semaphore, #tpu.memory_space<semaphore_mem>> -> memref<1x!tpu.dma_semaphore, #tpu.memory_space<semaphore_mem>>
      %166 = tpu.memref_squeeze %165 : memref<1x!tpu.dma_semaphore, #tpu.memory_space<semaphore_mem>> -> memref<!tpu.dma_semaphore, #tpu.memory_space<semaphore_mem>>
      tpu.wait_dma2 semaphore(%166 : memref<!tpu.dma_semaphore, #tpu.memory_space<semaphore_mem>>) src(%163 : memref<1x32xf32, #tpu.memory_space<any>>) dst(%164 : memref<1x32xf32, #tpu.memory_space<vmem>>)
    } else {
    }
    %c8_i32_68 = arith.constant 8 : i32
    %132 = arith.cmpi slt, %123, %c8_i32_68 : i32
    %133 = arith.addi %0, %123 : i32
    %c16_i32_69 = arith.constant 16 : i32
    %134 = arith.cmpi slt, %133, %c16_i32_69 : i32
    %135 = arith.andi %132, %134 : i1
    %136 = arith.extui %135 : i1 to i32
    %c0_i32_70 = arith.constant 0 : i32
    %137 = arith.cmpi ne, %136, %c0_i32_70 : i32
    scf.if %137 {
      %c8_i32_80 = arith.constant 8 : i32
      %c0_i32_81 = arith.constant 0 : i32
      %153 = arith.cmpi eq, %c8_i32_80, %c0_i32_81 : i32
      %c1_i32_82 = arith.constant 1 : i32
      %154 = arith.select %153, %c1_i32_82, %c8_i32_80 : i32
      %155 = arith.remsi %123, %154 : i32
      %c0_i32_83 = arith.constant 0 : i32
      %156 = arith.cmpi ne, %155, %c0_i32_83 : i32
      %c0_i32_84 = arith.constant 0 : i32
      %157 = arith.cmpi slt, %155, %c0_i32_84 : i32
      %c0_i32_85 = arith.constant 0 : i32
      %158 = arith.cmpi slt, %154, %c0_i32_85 : i32
      %159 = arith.xori %157, %158 : i1
      %160 = arith.andi %159, %156 : i1
      %161 = arith.addi %155, %154 : i32
      %162 = arith.select %160, %161, %155 : i32
      %c0_i32_86 = arith.constant 0 : i32
      %163 = tpu.memref_slice %arg2[%127, %c0_i32_86] : memref<32x32xf32, #tpu.memory_space<any>> -> memref<1x32xf32, #tpu.memory_space<any>>
      %c0_i32_87 = arith.constant 0 : i32
      %164 = tpu.memref_slice %arg3[%123, %c0_i32_87] : memref<8x32xf32, #tpu.memory_space<vmem>> -> memref<1x32xf32, #tpu.memory_space<vmem>>
      %165 = tpu.memref_slice %arg4[%162] : memref<32x!tpu.dma_semaphore, #tpu.memory_space<semaphore_mem>> -> memref<1x!tpu.dma_semaphore, #tpu.memory_space<semaphore_mem>>
      %166 = tpu.memref_squeeze %165 : memref<1x!tpu.dma_semaphore, #tpu.memory_space<semaphore_mem>> -> memref<!tpu.dma_semaphore, #tpu.memory_space<semaphore_mem>>
      tpu.enqueue_dma source(%163 : memref<1x32xf32, #tpu.memory_space<any>>) target(%164 : memref<1x32xf32, #tpu.memory_space<vmem>>) target_semaphore(%166 : memref<!tpu.dma_semaphore, #tpu.memory_space<semaphore_mem>>)
    } else {
    }
    %c7_i32_71 = arith.constant 7 : i32
    %c8_i32_72 = arith.constant 8 : i32
    %138 = arith.addi %c7_i32_71, %c8_i32_72 : i32
    %c7_i32_73 = arith.constant 7 : i32
    %139 = arith.minsi %138, %c7_i32_73 : i32
    %140 = arith.addi %0, %139 : i32
    %141 = arith.index_cast %140 : i32 to index
    %142 = memref.load %arg1[%141] : memref<16xi32, #tpu.memory_space<smem>>
    %143 = arith.addi %0, %c7_i32_71 : i32
    %c16_i32_74 = arith.constant 16 : i32
    %144 = arith.cmpi slt, %143, %c16_i32_74 : i32
    %145 = arith.extui %144 : i1 to i32
    %c0_i32_75 = arith.constant 0 : i32
    %146 = arith.cmpi ne, %145, %c0_i32_75 : i32
    scf.if %146 {
      %c8_i32_80 = arith.constant 8 : i32
      %c0_i32_81 = arith.constant 0 : i32
      %153 = arith.cmpi eq, %c8_i32_80, %c0_i32_81 : i32
      %c1_i32_82 = arith.constant 1 : i32
      %154 = arith.select %153, %c1_i32_82, %c8_i32_80 : i32
      %155 = arith.remsi %c7_i32_71, %154 : i32
      %c0_i32_83 = arith.constant 0 : i32
      %156 = arith.cmpi ne, %155, %c0_i32_83 : i32
      %c0_i32_84 = arith.constant 0 : i32
      %157 = arith.cmpi slt, %155, %c0_i32_84 : i32
      %c0_i32_85 = arith.constant 0 : i32
      %158 = arith.cmpi slt, %154, %c0_i32_85 : i32
      %159 = arith.xori %157, %158 : i1
      %160 = arith.andi %159, %156 : i1
      %161 = arith.addi %155, %154 : i32
      %162 = arith.select %160, %161, %155 : i32
      %c0_i32_86 = arith.constant 0 : i32
      %c0_i32_87 = arith.constant 0 : i32
      %163 = tpu.memref_slice %arg2[%c0_i32_86, %c0_i32_87] : memref<32x32xf32, #tpu.memory_space<any>> -> memref<1x32xf32, #tpu.memory_space<any>>
      %c0_i32_88 = arith.constant 0 : i32
      %164 = tpu.memref_slice %arg3[%c7_i32_71, %c0_i32_88] : memref<8x32xf32, #tpu.memory_space<vmem>> -> memref<1x32xf32, #tpu.memory_space<vmem>>
      %165 = tpu.memref_slice %arg4[%162] : memref<32x!tpu.dma_semaphore, #tpu.memory_space<semaphore_mem>> -> memref<1x!tpu.dma_semaphore, #tpu.memory_space<semaphore_mem>>
      %166 = tpu.memref_squeeze %165 : memref<1x!tpu.dma_semaphore, #tpu.memory_space<semaphore_mem>> -> memref<!tpu.dma_semaphore, #tpu.memory_space<semaphore_mem>>
      tpu.wait_dma2 semaphore(%166 : memref<!tpu.dma_semaphore, #tpu.memory_space<semaphore_mem>>) src(%163 : memref<1x32xf32, #tpu.memory_space<any>>) dst(%164 : memref<1x32xf32, #tpu.memory_space<vmem>>)
    } else {
    }
    %c8_i32_76 = arith.constant 8 : i32
    %147 = arith.cmpi slt, %138, %c8_i32_76 : i32
    %148 = arith.addi %0, %138 : i32
    %c16_i32_77 = arith.constant 16 : i32
    %149 = arith.cmpi slt, %148, %c16_i32_77 : i32
    %150 = arith.andi %147, %149 : i1
    %151 = arith.extui %150 : i1 to i32
    %c0_i32_78 = arith.constant 0 : i32
    %152 = arith.cmpi ne, %151, %c0_i32_78 : i32
    scf.if %152 {
      %c8_i32_80 = arith.constant 8 : i32
      %c0_i32_81 = arith.constant 0 : i32
      %153 = arith.cmpi eq, %c8_i32_80, %c0_i32_81 : i32
      %c1_i32_82 = arith.constant 1 : i32
      %154 = arith.select %153, %c1_i32_82, %c8_i32_80 : i32
      %155 = arith.remsi %138, %154 : i32
      %c0_i32_83 = arith.constant 0 : i32
      %156 = arith.cmpi ne, %155, %c0_i32_83 : i32
      %c0_i32_84 = arith.constant 0 : i32
      %157 = arith.cmpi slt, %155, %c0_i32_84 : i32
      %c0_i32_85 = arith.constant 0 : i32
      %158 = arith.cmpi slt, %154, %c0_i32_85 : i32
      %159 = arith.xori %157, %158 : i1
      %160 = arith.andi %159, %156 : i1
      %161 = arith.addi %155, %154 : i32
      %162 = arith.select %160, %161, %155 : i32
      %c0_i32_86 = arith.constant 0 : i32
      %163 = tpu.memref_slice %arg2[%142, %c0_i32_86] : memref<32x32xf32, #tpu.memory_space<any>> -> memref<1x32xf32, #tpu.memory_space<any>>
      %c0_i32_87 = arith.constant 0 : i32
      %164 = tpu.memref_slice %arg3[%138, %c0_i32_87] : memref<8x32xf32, #tpu.memory_space<vmem>> -> memref<1x32xf32, #tpu.memory_space<vmem>>
      %165 = tpu.memref_slice %arg4[%162] : memref<32x!tpu.dma_semaphore, #tpu.memory_space<semaphore_mem>> -> memref<1x!tpu.dma_semaphore, #tpu.memory_space<semaphore_mem>>
      %166 = tpu.memref_squeeze %165 : memref<1x!tpu.dma_semaphore, #tpu.memory_space<semaphore_mem>> -> memref<!tpu.dma_semaphore, #tpu.memory_space<semaphore_mem>>
      tpu.enqueue_dma source(%163 : memref<1x32xf32, #tpu.memory_space<any>>) target(%164 : memref<1x32xf32, #tpu.memory_space<vmem>>) target_semaphore(%166 : memref<!tpu.dma_semaphore, #tpu.memory_space<semaphore_mem>>)
    } else {
    }
    %c8_i32_79 = arith.constant 8 : i32
    return
  }
  func.func @transform_1(%arg0: i32, %arg1: memref<16xi32, #tpu.memory_space<smem>>) -> (i32, i32) {
    %c0_i32 = arith.constant 0 : i32
    %c0_i32_0 = arith.constant 0 : i32
    return %arg0, %c0_i32 : i32, i32
  }
}

</mosaic_0001>

<bundles_post_ra>
// kernel: tpu_custom_call.1
= control target key start
LH: loop header
LB: loop body
LE: loop exit
PB: predicated region body
PF: predicated region fallthrough
CT: control target
= control target key end

     0   :  { %s1121_s9 = smov [#allocation4]   ;;  %s1638_s0 = inlined_call_operand.hbm [shape: s32[16], index: 0, kind: input, shape index: {}]   ;;  %s1639_s1 = inlined_call_operand.hbm [shape: f32[32,32], index: 1, kind: input, shape index: {}]   ;;  %s1640_s2 = inlined_call_operand.hbm [shape: f32[16,32], index: 2, kind: output, shape index: {}]  }
   0x1   :  { %1678 = sst [smem:[#allocation55_spill]] %s1640_s2 }
   0x2   :  { %8 = dma.hbm_to_smem %s1638_s0, 16, %s1121_s9, [#allocation3] }
   0x3   :  { %1071 = dma.done.wait [#allocation3], 16 }
   0x4   :  { %1072 = vsyncadd [#allocation3], 4294967280 }
   0x5   :  { %10 = sfence }
   0x6   :  { %11 = vsyncpa [#allocation6], 0 }
   0x7   :  { %13 = vsyncpa [#allocation6 + $0x1], 0  ;;  %s1141_s12 = smov 0   ;;  %s1143_s13 = smov 0  }
   0x8   :  { %s1145_s14 = smov 0  }
   0x9 LB: > { %s569_s0 = sadd.s32 4294967295, %s1119_s14   ;;  %s1158_s15 = sadd.s32 1, %s1119_s14   ;;  %s1119_s14 = sphi %s1145_s14, %s1755_s14   ;;  %s1115_s13 = sphi %s1143_s13, %s1758_s13   ;;  %s1111_s12 = sphi %s1141_s12, %s1757_s12  }
   0xa   : > { %1679 = sst [smem:[#allocation51_spill]] %s1158_s15  ;;  %s22_s16 = ssub.s32 %s1119_s14, %s1158_s15 }
   0xb   : > { %s25_s17 = sadd.s32 1, %s1115_s13  ;;  %p23_p0 = scmp.eq.s32.totalorder %s22_s16, 0 }
   0xc   : > { %p570_p1 = scmp.ne.s32.totalorder %s22_s16, 0  ;;  %p29_p2 = scmp.eq.s32.totalorder %s1119_s14, 1 }
   0xd   : > { %p34_p3 = scmp.ne.s32.totalorder %s1115_s13, %s1111_s12  ;;  %p35_p5 = scmp.eq.s32.totalorder %s569_s0, 1 }
   0xe   : > { %s1167_s18 = scalar_select %p23_p0, %s1115_s13, %s25_s17  }
   0xf   : > { %p1169_p4 = por %p570_p1, %p29_p2  ;;  %p1643_p6 = scmp.lt.s32.totalorder %s1119_s14, 2 }
  0x10   : > { %1680 = sst [smem:[#allocation52_spill]] %s1167_s18  ;;  %p1174_p7 = por %p35_p5, %p34_p3 }
  0x11   : > { %s1681_s19 = scalar_select %p1169_p4, 1, 0 }
  0x12   : > { %s1682_s20 = scalar_select %p1174_p7, 1, 0 }
  0x13   : > { %s1649_s21 = sand.u32 1, %s1115_s13   ;;  %s1182_s23 = sshll.u32 %s1119_s14, 3 }
  0x14   : > { %1683 = sst [smem:[#allocation53_spill]] %s1682_s20  ;;  %s572_s22 = sshll.u32 %s1649_s21, 3 }
  0x15   : > { %p757_p8 = scmp.lt.s32.totalorder %s1182_s23, 16  ;;  %s1185_s24 = scalar_lea.vmem [#allocation5], %s572_s22 }
  0x16   : > { %s67_s25 = sshll.u32 %s1185_s24, 4  ;;  %s71_s26 = sadd.s32 1, %s1182_s23  ;;  %s1188_s25 = int_to_ptr.vmem [resolvable:$true] %s67_s25 }
  0x17   : > { %1684 = sst [smem:[#allocation54_spill]] %s1188_s25  ;;  %p1198_p9 = pnand %p757_p8, %p1643_p6 }
  0x18   : > { %s635_s27 = scalar_select %p757_p8, [#allocation4], [#allocation25] }
  0x19   : > { %s636_s28 = scalar_select %p757_p8, %s1182_s23, 0 }
  0x1a   : > { %s1760_s27 = smov (!%p1643_p6, %s635_s27), [#allocation33]  ;;  %p1202_p10 = scmp.lt.s32.totalorder %s71_s26, 16 }
  0x1b   : > { %s1762_s28 = smov (!%p1643_p6, %s636_s28), 0  ;;  %p1642_p11 = pneg %p1198_p9 }
  0x1c   : > { %s1685_s29 = scalar_select %p1198_p9, 1, 0 }
  0x1d   : > { %s57_s30 = sld [smem:[%s1760_s27 + %s1762_s28]]  ;;  %s79_s4 = scalar_lea.vmem %s1185_s24, 1 [#allocation5] }
  0x1e   : > { %s639_s5 = scalar_select %p1202_p10, [#allocation4], [#allocation26] }
  0x1f   : > { %s1764_s26 = smov (!%p1202_p10, %s71_s26), 0  ;;  %s88_s7 = sshll.u32 %s79_s4, 4  ;;  %s1253_s7 = int_to_ptr.vmem [resolvable:$true] %s88_s7 }
  0x20   : > { %s1766_s5 = smov (!%p1643_p6, %s639_s5), [#allocation34]  ;;  %s1768_s26 = smov (!%p1643_p6, %s1764_s26), 0 }
  0x21   : > { %s1220_s11 = sld [smem:[%s1766_s5 + %s1768_s26]]  ;;  %s1228_s22 = scalar_lea.hbm %s1639_s1, 512 }
  0x23   : > { %s575_s6 = sshll.u32 %s57_s30, 4 }
  0x24   : > { %s59_s10 = scalar_lea.hbm %s1639_s1, %s575_s6 }
  0x25   : > { %s807_s0 = scalar_lea.hbm %s59_s10, 16  ;;  %p813_p1 = scmp.lt.s32.totalorder %s59_s10, %s1639_s1 }
  0x26   : > { %p808_p12 = scmp.ne.s32.totalorder %s59_s10, %s807_s0  ;;  %p814_p2 = scmp.lt.s32.totalorder %s1228_s22, %s807_s0 }
  0x28   : > { %p810_p13 = pnand %p808_p12, %p1642_p11  ;;  %p815_p3 = por %p814_p2, %p813_p1 }
  0x2a   : > { %p811_p0 = pneg %p810_p13 }
  0x2c   : > { %p816_p5 = pnand %p815_p3, %p811_p0 }
  0x2e   : > { %819 = shalt.err (!%p816_p5)  }
  0x2f   : > { %s820_s26 = scalar_lea.vmem %s1188_s25, 16  ;;  %s1122_s30 = smov [#allocation5]  }
  0x30   : > { %p821_p8 = scmp.ne.s32.totalorder %s1188_s25, %s820_s26  ;;  %s825_s4 = sshll.u32 %s1122_s30, 4  ;;  %s1239_s4 = int_to_ptr.vmem [resolvable:$false] %s825_s4 }
  0x31   : > { %s1242_s5 = scalar_lea.vmem %s1239_s4, 256  ;;  %p1641_p0 = scmp.lt.s32.totalorder %s1188_s25, %s1239_s4 }
  0x32   : > { %p823_p12 = pnand %p821_p8, %p1642_p11  ;;  %p829_p1 = scmp.lt.s32.totalorder %s1242_s5, %s820_s26 }
  0x34   : > { %p824_p13 = pneg %p823_p12  ;;  %p830_p2 = por %p829_p1, %p1641_p0 }
  0x36   : > { %p831_p3 = pnand %p830_p2, %p824_p13 }
  0x38   : > { %834 = shalt.err (!%p831_p3)  }
  0x39   : > { %689 = dma.hbm_to_vmem [thread:$0]  (!%p1198_p9), %s59_s10, 16, %s1188_s25, [#allocation2] }
  0x3a   : > { %p1259_p5 = pnand %p1202_p10, %p1643_p6  ;;  %s92_s8 = sadd.s32 2, %s1182_s23 }
  0x3b   : > { %s100_s9 = scalar_lea.vmem %s1185_s24, 2 [#allocation5]  ;;  %p1267_p12 = scmp.lt.s32.totalorder %s92_s8, 16 }
  0x3c   : > { %s1687_s6 = scalar_select %p1259_p5, 1, 0 }
  0x3d   : > { %p1650_p8 = pneg %p1259_p5  ;;  %s109_s10 = sshll.u32 %s100_s9, 4  ;;  %s1272_s10 = int_to_ptr.vmem [resolvable:$true] %s109_s10 }
  0x3e   : > { %s1688_s0 = scalar_select %p1267_p12, 1, 0 }
  0x3f   : > { %s577_s16 = sshll.u32 %s1220_s11, 4  ;;  %p1281_p10 = pnand %p1267_p12, %p1643_p6 }
  0x40   : > { %s78_s27 = scalar_lea.hbm %s1639_s1, %s577_s16 }
  0x41   : > { %s1689_s28 = scalar_select %p1281_p10, 1, 0 }
  0x42   : > { %s835_s26 = scalar_lea.hbm %s78_s27, 16  ;;  %p841_p3 = scmp.lt.s32.totalorder %s78_s27, %s1639_s1 }
  0x43   : > { %p836_p13 = scmp.ne.s32.totalorder %s78_s27, %s835_s26  ;;  %p842_p0 = scmp.lt.s32.totalorder %s1228_s22, %s835_s26 }
  0x45   : > { %p838_p1 = pnand %p836_p13, %p1650_p8  ;;  %p843_p11 = por %p842_p0, %p841_p3 }
  0x47   : > { %p839_p2 = pneg %p838_p1 }
  0x49   : > { %p844_p7 = pnand %p843_p11, %p839_p2 }
  0x4b   : > { %847 = shalt.err (!%p844_p7)  }
  0x4c   : > { %s848_s9 = scalar_lea.vmem %s1253_s7, 16  ;;  %p856_p4 = scmp.lt.s32.totalorder %s1253_s7, %s1239_s4 }
  0x4d   : > { %p849_p6 = scmp.ne.s32.totalorder %s1253_s7, %s848_s9  ;;  %p857_p9 = scmp.lt.s32.totalorder %s1242_s5, %s848_s9 }
  0x4f   : > { %p851_p13 = pnand %p849_p6, %p1650_p8  ;;  %p858_p10 = por %p857_p9, %p856_p4 }
  0x51   : > { %p852_p1 = pneg %p851_p13 }
  0x53   : > { %p859_p12 = pnand %p858_p10, %p852_p1 }
  0x55   : > { %862 = shalt.err (!%p859_p12)  }
  0x56   : > { %694 = dma.hbm_to_vmem [thread:$0]  (!%p1259_p5), %s78_s27, 16, %s1253_s7, [#allocation2 + $0x1] }
  0x57   : > { %p1690_p6 = scmp.ne.s32.totalorder %s1688_s0, 0  ;;  %p1691_p4 = scmp.lt.s32.totalorder %s1119_s14, 2 }
  0x58   : > { %p1693_p9 = scmp.ne.s32.totalorder %s1689_s28, 0  ;;  %s113_s3 = sadd.s32 3, %s1182_s23 }
  0x59   : > { %s643_s16 = scalar_select %p1690_p6, [#allocation4], [#allocation27] }
  0x5a   : > { %s1770_s8 = smov (!%p1690_p6, %s92_s8), 0  ;;  %p1692_p7 = pmov %p1691_p4 }
  0x5b   : > { %s1772_s16 = smov (!%p1691_p4, %s643_s16), [#allocation35]  ;;  %p1657_p11 = pneg %p1693_p9 }
  0x5c   : > { %s1774_s8 = smov (!%p1692_p7, %s1770_s8), 0  ;;  %p760_p0 = scmp.lt.s32.totalorder %s113_s3, 16 }
  0x5d   : > { %s97_s17 = sld [smem:[%s1772_s16 + %s1774_s8]]  ;;  %s121_s26 = scalar_lea.vmem %s1185_s24, 3 [#allocation5] }
  0x5e   : > { %s130_s30 = sshll.u32 %s121_s26, 4  ;;  %s134_s11 = sadd.s32 4, %s1182_s23  ;;  %s1318_s30 = int_to_ptr.vmem [resolvable:$true] %s130_s30 }
  0x5f   : > { %s647_s7 = scalar_select %p760_p0, [#allocation4], [#allocation28] }
  0x60   : > { %s1776_s3 = smov (!%p760_p0, %s113_s3), 0  ;;  %p1694_p12 = pmov %p1691_p4 }
  0x61   : > { %p1695_p10 = pmov %p1691_p4 }
  0x62   : > { %s1778_s7 = smov (!%p1694_p12, %s647_s7), [#allocation36] }
  0x63   : > { %s579_s0 = sshll.u32 %s97_s17, 4  ;;  %p1325_p2 = pnand %p760_p0, %p1695_p10 }
  0x64   : > { %s99_s21 = scalar_lea.hbm %s1639_s1, %s579_s0 }
  0x65   : > { %s1696_s18 = scalar_select %p1325_p2, 1, 0 }
  0x66   : > { %s863_s8 = scalar_lea.hbm %s99_s21, 16  ;;  %p869_p6 = scmp.lt.s32.totalorder %s99_s21, %s1639_s1 }
  0x67   : > { %p864_p3 = scmp.ne.s32.totalorder %s99_s21, %s863_s8  ;;  %p870_p4 = scmp.lt.s32.totalorder %s1228_s22, %s863_s8 }
  0x69   : > { %p866_p13 = pnand %p864_p3, %p1657_p11  ;;  %p871_p7 = por %p870_p4, %p869_p6 }
  0x6b   : > { %p867_p1 = pneg %p866_p13 }
  0x6d   : > { %p872_p12 = pnand %p871_p7, %p867_p1 }
  0x6f   : > { %875 = shalt.err (!%p872_p12)  }
  0x70   : > { %s876_s17 = scalar_lea.vmem %s1272_s10, 16  ;;  %p884_p13 = scmp.lt.s32.totalorder %s1272_s10, %s1239_s4 }
  0x71   : > { %p877_p0 = scmp.ne.s32.totalorder %s1272_s10, %s876_s17  ;;  %p885_p8 = scmp.lt.s32.totalorder %s1242_s5, %s876_s17 }
  0x73   : > { %p879_p10 = pnand %p877_p0, %p1657_p11  ;;  %p886_p5 = por %p885_p8, %p884_p13 }
  0x75   : > { %p880_p3 = pneg %p879_p10 }
  0x77   : > { %p887_p2 = pnand %p886_p5, %p880_p3 }
  0x79   : > { %890 = shalt.err (!%p887_p2)  }
  0x7a   : > { %699 = dma.hbm_to_vmem [thread:$0]  (!%p1693_p9), %s99_s21, 16, %s1272_s10, [#allocation2 + $0x2] }
  0x7b   : > { %p1697_p1 = scmp.lt.s32.totalorder %s1119_s14, 2  ;;  %p1698_p6 = scmp.ne.s32.totalorder %s1696_s18, 0 }
  0x7c   : > { %p1353_p5 = scmp.lt.s32.totalorder %s134_s11, 16  ;;  %s142_s9 = scalar_lea.vmem %s1185_s24, 4 [#allocation5] }
  0x7d   : > { %s1780_s3 = smov (!%p1697_p1, %s1776_s3), 0  ;;  %p1660_p4 = pneg %p1698_p6 }
  0x7e   : > { %s118_s0 = sld [smem:[%s1778_s7 + %s1780_s3]]  ;;  %s1782_s11 = smov (!%p1353_p5, %s134_s11), 0 }
  0x7f   : > { %s1699_s27 = scalar_select %p1353_p5, 1, 0 }
  0x80   : > { %s651_s16 = scalar_select %p1353_p5, [#allocation4], [#allocation29] }
  0x81   : > { %p1700_p8 = pmov %p1697_p1  ;;  %p1701_p2 = pmov %p1697_p1 }
  0x82   : > { %s151_s10 = sshll.u32 %s142_s9, 4  ;;  %s152_s10 = int_to_ptr.vmem [resolvable:$true] %s151_s10 }
  0x83   : > { %s1784_s16 = smov (!%p1700_p8, %s651_s16), [#allocation37]  ;;  %s1786_s11 = smov (!%p1701_p2, %s1782_s11), 0 }
  0x84   : > { %s581_s21 = sshll.u32 %s118_s0, 4  ;;  %s139_s17 = sld [smem:[%s1784_s16 + %s1786_s11]] }
  0x85   : > { %s120_s26 = scalar_lea.hbm %s1639_s1, %s581_s21 }
  0x86   : > { %s891_s15 = scalar_lea.hbm %s120_s26, 16  ;;  %p897_p10 = scmp.lt.s32.totalorder %s120_s26, %s1639_s1 }
  0x87   : > { %p892_p7 = scmp.ne.s32.totalorder %s120_s26, %s891_s15  ;;  %p898_p3 = scmp.lt.s32.totalorder %s1228_s22, %s891_s15 }
  0x89   : > { %p894_p12 = pnand %p892_p7, %p1660_p4  ;;  %p899_p13 = por %p898_p3, %p897_p10 }
  0x8b   : > { %p895_p0 = pneg %p894_p12 }
  0x8d   : > { %p900_p1 = pnand %p899_p13, %p895_p0 }
  0x8f   : > { %903 = shalt.err (!%p900_p1)  }
  0x90   : > { %s904_s11 = scalar_lea.vmem %s1318_s30, 16  ;;  %p912_p12 = scmp.lt.s32.totalorder %s1318_s30, %s1239_s4 }
  0x91   : > { %p905_p8 = scmp.ne.s32.totalorder %s1318_s30, %s904_s11  ;;  %p913_p11 = scmp.lt.s32.totalorder %s1242_s5, %s904_s11 }
  0x93   : > { %p907_p2 = pnand %p905_p8, %p1660_p4  ;;  %p914_p9 = por %p913_p11, %p912_p12 }
  0x95   : > { %p908_p7 = pneg %p907_p2 }
  0x97   : > { %p915_p5 = pnand %p914_p9, %p908_p7 }
  0x99   : > { %918 = shalt.err (!%p915_p5)  }
  0x9a   : > { %704 = dma.hbm_to_vmem [thread:$0]  (!%p1698_p6), %s120_s26, 16, %s1318_s30, [#allocation2 + $0x3] }
  0x9b   : > { %p1702_p0 = scmp.lt.s32.totalorder %s1119_s14, 2  ;;  %p1703_p10 = scmp.ne.s32.totalorder %s1699_s27, 0 }
  0x9c   : > { %s1705_s20 = sadd.s32 5, %s1182_s23  ;;  %s163_s9 = scalar_lea.vmem %s1185_s24, 5 [#allocation5] }
  0x9d   : > { %p1394_p3 = pnand %p1703_p10, %p1702_p0  ;;  %p1400_p9 = scmp.lt.s32.totalorder %s1705_s20, 16 }
  0x9e   : > { %s583_s8 = sshll.u32 %s139_s17, 4  ;;  %s172_s3 = sshll.u32 %s163_s9, 4  ;;  %s173_s3 = int_to_ptr.vmem [resolvable:$true] %s172_s3 }
  0x9f   : > { %s1704_s15 = scalar_select %p1394_p3, 1, 0 }
  0xa0   : > { %s1706_s0 = scalar_select %p1400_p9, 1, 0 }
  0xa1   : > { %p1667_p11 = pneg %p1394_p3  ;;  %s141_s21 = scalar_lea.hbm %s1639_s1, %s583_s8 }
  0xa2   : > { %s655_s30 = scalar_select %p1400_p9, [#allocation4], [#allocation30] }
  0xa3   : > { %s919_s7 = scalar_lea.hbm %s141_s21, 16  ;;  %p925_p8 = scmp.lt.s32.totalorder %s141_s21, %s1639_s1 }
  0xa4   : > { %p920_p5 = scmp.ne.s32.totalorder %s141_s21, %s919_s7  ;;  %p926_p2 = scmp.lt.s32.totalorder %s1228_s22, %s919_s7 }
  0xa6   : > { %p922_p13 = pnand %p920_p5, %p1667_p11  ;;  %p927_p7 = por %p926_p2, %p925_p8 }
  0xa8   : > { %p923_p1 = pneg %p922_p13 }
  0xaa   : > { %p928_p12 = pnand %p927_p7, %p923_p1 }
  0xac   : > { %931 = shalt.err (!%p928_p12)  }
  0xad   : > { %s932_s17 = scalar_lea.vmem %s152_s10, 16  ;;  %p940_p6 = scmp.lt.s32.totalorder %s152_s10, %s1239_s4 }
  0xae   : > { %p933_p0 = scmp.ne.s32.totalorder %s152_s10, %s932_s17  ;;  %p941_p5 = scmp.lt.s32.totalorder %s1242_s5, %s932_s17 }
  0xb0   : > { %p935_p10 = pnand %p933_p0, %p1667_p11  ;;  %p942_p13 = por %p941_p5, %p940_p6 }
  0xb2   : > { %p936_p4 = pneg %p935_p10 }
  0xb4   : > { %p943_p9 = pnand %p942_p13, %p936_p4 }
  0xb6   : > { %946 = shalt.err (!%p943_p9)  }
  0xb7   : > { %709 = dma.hbm_to_vmem [thread:$0]  (!%p1394_p3), %s141_s21, 16, %s152_s10, [#allocation2 + $0x4] }
  0xb8   : > { %p1707_p1 = scmp.ne.s32.totalorder %s1706_s0, 0  ;;  %p1708_p8 = scmp.lt.s32.totalorder %s1119_s14, 2 }
  0xb9   : > { %s176_s8 = sadd.s32 6, %s1182_s23  ;;  %s184_s27 = scalar_lea.vmem %s1185_s24, 6 [#allocation5] }
  0xba   : > { %s1788_s20 = smov (!%p1707_p1, %s1705_s20), 0  ;;  %s1790_s30 = smov (!%p1708_p8, %s655_s30), [#allocation38] }
  0xbb   : > { %p1709_p6 = pmov %p1708_p8  ;;  %p1445_p7 = scmp.lt.s32.totalorder %s176_s8, 16 }
  0xbc   : > { %s197_s7 = sadd.s32 7, %s1182_s23  ;;  %s193_s17 = sshll.u32 %s184_s27, 4  ;;  %s194_s17 = int_to_ptr.vmem [resolvable:$true] %s193_s17 }
  0xbd   : > { %s1792_s20 = smov (!%p1709_p6, %s1788_s20), 0  ;;  %p1710_p4 = pmov %p1709_p6 }
  0xbe   : > { %s160_s16 = sld [smem:[%s1790_s30 + %s1792_s20]]  ;;  %s1794_s8 = smov (!%p1445_p7, %s176_s8), 0 }
  0xbf   : > { %p1438_p9 = pnand %p1707_p1, %p1710_p4  ;;  %p1713_p12 = pmov %p1710_p4 }
  0xc0   : > { %s1712_s10 = scalar_select %p1445_p7, 1, 0 }
  0xc1   : > { %s1711_s9 = scalar_select %p1438_p9, 1, 0 }
  0xc2   : > { %p1671_p2 = pneg %p1438_p9 }
  0xc3   : > { %s659_s0 = scalar_select %p1445_p7, [#allocation4], [#allocation31] }
  0xc4   : > { %s585_s21 = sshll.u32 %s160_s16, 4 }
  0xc5   : > { %s1796_s0 = smov (!%p1713_p12, %s659_s0), [#allocation39]  ;;  %s162_s11 = scalar_lea.hbm %s1639_s1, %s585_s21 }
  0xc6   : > { %s947_s20 = scalar_lea.hbm %s162_s11, 16  ;;  %p953_p13 = scmp.lt.s32.totalorder %s162_s11, %s1639_s1 }
  0xc7   : > { %p948_p0 = scmp.ne.s32.totalorder %s162_s11, %s947_s20  ;;  %p954_p1 = scmp.lt.s32.totalorder %s1228_s22, %s947_s20 }
  0xc9   : > { %p950_p10 = pnand %p948_p0, %p1671_p2  ;;  %p955_p8 = por %p954_p1, %p953_p13 }
  0xcb   : > { %p951_p5 = pneg %p950_p10 }
  0xcd   : > { %p956_p6 = pnand %p955_p8, %p951_p5 }
  0xcf   : > { %959 = shalt.err (!%p956_p6)  }
  0xd0   : > { %s960_s23 = scalar_lea.vmem %s173_s3, 16  ;;  %p968_p3 = scmp.lt.s32.totalorder %s173_s3, %s1239_s4 }
  0xd1   : > { %p961_p4 = scmp.ne.s32.totalorder %s173_s3, %s960_s23  ;;  %p969_p0 = scmp.lt.s32.totalorder %s1242_s5, %s960_s23 }
  0xd3   : > { %p963_p12 = pnand %p961_p4, %p1671_p2  ;;  %p970_p10 = por %p969_p0, %p968_p3 }
  0xd5   : > { %p964_p11 = pneg %p963_p12 }
  0xd7   : > { %p971_p7 = pnand %p970_p10, %p964_p11 }
  0xd9   : > { %974 = shalt.err (!%p971_p7)  }
  0xda   : > { %714 = dma.hbm_to_vmem [thread:$0]  (!%p1438_p9), %s162_s11, 16, %s173_s3, [#allocation2 + $0x5] }
  0xdb   : > { %p1714_p5 = scmp.lt.s32.totalorder %s1119_s14, 2  ;;  %p1716_p1 = scmp.ne.s32.totalorder %s1712_s10, 0 }
  0xdc   : > { %p1484_p3 = scmp.lt.s32.totalorder %s197_s7, 16 }
  0xdd   : > { %s1798_s8 = smov (!%p1714_p5, %s1794_s8), 0  ;;  %p1715_p13 = pmov %p1714_p5 }
  0xde   : > { %s181_s25 = sld [smem:[%s1796_s0 + %s1798_s8]]  ;;  %s1800_s7 = smov (!%p1484_p3, %s197_s7), 0 }
  0xdf   : > { %p1480_p8 = pnand %p1716_p1, %p1715_p13  ;;  %p1719_p7 = pmov %p1714_p5 }
  0xe0   : > { %s1718_s16 = scalar_select %p1484_p3, 1, 0 }
  0xe1   : > { %s1717_s2 = scalar_select %p1480_p8, 1, 0 }
  0xe2   : > { %p1675_p11 = pneg %p1480_p8  ;;  %p1720_p6 = pmov %p1714_p5 }
  0xe3   : > { %s663_s3 = scalar_select %p1484_p3, [#allocation4], [#allocation32] }
  0xe4   : > { %s1804_s7 = smov (!%p1720_p6, %s1800_s7), 0  ;;  %s587_s10 = sshll.u32 %s181_s25, 4 }
  0xe5   : > { %s1802_s3 = smov (!%p1719_p7, %s663_s3), [#allocation40]  ;;  %s205_s8 = scalar_lea.vmem %s1185_s24, 7 [#allocation5] }
  0xe6   : > { %s183_s21 = scalar_lea.hbm %s1639_s1, %s587_s10  ;;  %s202_s30 = sld [smem:[%s1802_s3 + %s1804_s7]] }
  0xe7   : > { %s975_s26 = scalar_lea.hbm %s183_s21, 16  ;;  %p981_p10 = scmp.lt.s32.totalorder %s183_s21, %s1639_s1 }
  0xe8   : > { %p976_p4 = scmp.ne.s32.totalorder %s183_s21, %s975_s26  ;;  %p982_p5 = scmp.lt.s32.totalorder %s1228_s22, %s975_s26 }
  0xea   : > { %p978_p12 = pnand %p976_p4, %p1675_p11  ;;  %p983_p13 = por %p982_p5, %p981_p10 }
  0xec   : > { %p979_p0 = pneg %p978_p12 }
  0xee   : > { %p984_p1 = pnand %p983_p13, %p979_p0 }
  0xf0   : > { %987 = shalt.err (!%p984_p1)  }
  0xf1   : > { %s988_s24 = scalar_lea.vmem %s194_s17, 16  ;;  %p996_p9 = scmp.lt.s32.totalorder %s194_s17, %s1239_s4 }
  0xf2   : > { %p989_p7 = scmp.ne.s32.totalorder %s194_s17, %s988_s24  ;;  %p997_p4 = scmp.lt.s32.totalorder %s1242_s5, %s988_s24 }
  0xf4   : > { %p991_p6 = pnand %p989_p7, %p1675_p11  ;;  %p998_p12 = por %p997_p4, %p996_p9 }
  0xf6   : > { %p992_p2 = pneg %p991_p6 }
  0xf8   : > { %p999_p3 = pnand %p998_p12, %p992_p2 }
  0xfa   : > { %1002 = shalt.err (!%p999_p3)  }
  0xfb   : > { %719 = dma.hbm_to_vmem [thread:$0]  (!%p1480_p8), %s183_s21, 16, %s194_s17, [#allocation2 + $0x6] }
  0xfc   : > { %s214_s7 = sshll.u32 %s205_s8, 4  ;;  %p1721_p0 = scmp.lt.s32.totalorder %s1119_s14, 2  ;;  %s215_s7 = int_to_ptr.vmem [resolvable:$true] %s214_s7 }
  0xfd   : > { %p1722_p10 = scmp.ne.s32.totalorder %s1718_s16, 0  ;;  %s589_s25 = sshll.u32 %s202_s30, 4 }
  0xfe   : > { %s204_s27 = scalar_lea.hbm %s1639_s1, %s589_s25 }
  0xff   : > { %p1520_p5 = pnand %p1722_p10, %p1721_p0  ;;  %s1003_s0 = scalar_lea.hbm %s204_s27, 16 }
 0x100   : > { %p1004_p9 = scmp.ne.s32.totalorder %s204_s27, %s1003_s0  ;;  %p1009_p1 = scmp.lt.s32.totalorder %s204_s27, %s1639_s1 }
 0x101   : > { %p723_p13 = pneg %p1520_p5  ;;  %p1010_p7 = scmp.lt.s32.totalorder %s1228_s22, %s1003_s0 }
 0x103   : > { %p1006_p2 = pnand %p1004_p9, %p723_p13  ;;  %p1011_p6 = por %p1010_p7, %p1009_p1 }
 0x105   : > { %p1007_p3 = pneg %p1006_p2 }
 0x107   : > { %p1012_p4 = pnand %p1011_p6, %p1007_p3 }
 0x109   : > { %1015 = shalt.err (!%p1012_p4)  }
 0x10a   : > { %s1016_s8 = scalar_lea.vmem %s215_s7, 16  ;;  %p1024_p11 = scmp.lt.s32.totalorder %s215_s7, %s1239_s4 }
 0x10b   : > { %p1017_p12 = scmp.ne.s32.totalorder %s215_s7, %s1016_s8  ;;  %p1025_p9 = scmp.lt.s32.totalorder %s1242_s5, %s1016_s8 }
 0x10d   : > { %p1019_p0 = pnand %p1017_p12, %p723_p13  ;;  %p1026_p2 = por %p1025_p9, %p1024_p11 }
 0x10f   : > { %p1020_p10 = pneg %p1019_p0 }
 0x111   : > { %p1027_p8 = pnand %p1026_p2, %p1020_p10 }
 0x113   : > { %1030 = shalt.err (!%p1027_p8)  }
 0x114   : > { %724 = dma.hbm_to_vmem [thread:$0]  (!%p1520_p5), %s204_s27, 16, %s215_s7, [#allocation2 + $0x7] }
 0x115   : > { %p1724_p3 = scmp.ne.s32.totalorder %s1685_s29, 0 }
 0x117   : > { %p1725_p1 = pneg %p1724_p3 }
 0x119   : > { %1074 = dma.done.wait (%p1725_p1), [#allocation2], 16  ;;  %p1726_p7 = pmov %p1725_p1 }
 0x11a   : > { %p1727_p6 = scmp.ne.s32.totalorder %s1687_s6, 0 }
 0x11b   : > { %1076 = vsyncadd (%p1726_p7), [#allocation2], 4294967280 }
 0x11c   : > { %p1728_p4 = pneg %p1727_p6 }
 0x11e   : > { %1078 = dma.done.wait (%p1728_p4), [#allocation2 + $0x1], 16  ;;  %p1729_p11 = pmov %p1728_p4 }
 0x11f   : > { %p1730_p8 = scmp.ne.s32.totalorder %s1689_s28, 0 }
 0x120   : > { %1080 = vsyncadd (%p1729_p11), [#allocation2 + $0x1], 4294967280 }
 0x121   : > { %p1731_p12 = pneg %p1730_p8 }
 0x123   : > { %1082 = dma.done.wait (%p1731_p12), [#allocation2 + $0x2], 16  ;;  %p1732_p0 = pmov %p1731_p12 }
 0x124   : > { %p1733_p10 = scmp.ne.s32.totalorder %s1696_s18, 0 }
 0x125   : > { %1084 = vsyncadd (%p1732_p0), [#allocation2 + $0x2], 4294967280 }
 0x126   : > { %p1734_p9 = pneg %p1733_p10 }
 0x128   : > { %1086 = dma.done.wait (%p1734_p9), [#allocation2 + $0x3], 16  ;;  %p1735_p2 = pmov %p1734_p9 }
 0x129   : > { %p1736_p3 = scmp.ne.s32.totalorder %s1704_s15, 0 }
 0x12a   : > { %1088 = vsyncadd (%p1735_p2), [#allocation2 + $0x3], 4294967280 }
 0x12b   : > { %p1737_p1 = pneg %p1736_p3 }
 0x12d   : > { %1090 = dma.done.wait (%p1737_p1), [#allocation2 + $0x4], 16  ;;  %p1738_p7 = pmov %p1737_p1 }
 0x12e   : > { %p1739_p6 = scmp.ne.s32.totalorder %s1711_s9, 0 }
 0x12f   : > { %1092 = vsyncadd (%p1738_p7), [#allocation2 + $0x4], 4294967280 }
 0x130   : > { %p1740_p4 = pneg %p1739_p6 }
 0x132   : > { %1094 = dma.done.wait (%p1740_p4), [#allocation2 + $0x5], 16  ;;  %p1741_p11 = pmov %p1740_p4 }
 0x133   : > { %p1742_p8 = scmp.ne.s32.totalorder %s1717_s2, 0 }
 0x134   : > { %1096 = vsyncadd (%p1741_p11), [#allocation2 + $0x5], 4294967280 }
 0x135   : > { %p1743_p12 = pneg %p1742_p8 }
 0x137   : > { %1098 = dma.done.wait (%p1743_p12), [#allocation2 + $0x6], 16  ;;  %p1744_p0 = pmov %p1743_p12 }
 0x139   : > { %1100 = vsyncadd (%p1744_p0), [#allocation2 + $0x6], 4294967280 }
 0x13a   : > { %1102 = dma.done.wait (%p723_p13), [#allocation2 + $0x7], 16 }
 0x13b   : > { %1104 = vsyncadd (%p723_p13), [#allocation2 + $0x7], 4294967280  ;;  %s1745_s18 = sld [smem:[#allocation54_spill]]  ;;  %s599_s29 = sshll.u32 %s1119_s14, 7 }
 0x13c   : > { %s1746_s28 = sld [smem:[#allocation55_spill]]  ;;  %p1747_p10 = scmp.ne.s32.totalorder %s1681_s19, 0 }
 0x13d   : > { %p1748_p9 = scmp.lt.s32.totalorder %s1119_s14, 2  ;;  %s299_s2 = sand.u32 1, %s1111_s12  }
 0x13e   : > { %s1750_s21 = sand.u32 1, %s1115_s13  }
 0x13f   : > { %p1599_p5 = pnand %p1748_p9, %p1747_p10  ;;  %s274_s30 = scalar_lea.sflag [#allocation6], %s1750_s21 }
 0x141   : > { %s1031_s26 = scalar_lea.vmem %s1745_s18, 128  ;;  %p1033_p3 = pneg %p1599_p5 }
 0x142   : > { %s285_s15 = scalar_lea.hbm %s1746_s28, %s599_s29  ;;  %p1032_p2 = scmp.ne.s32.totalorder %s1745_s18, %s1031_s26 }
 0x143   : > { %p1040_p6 = scmp.lt.s32.totalorder %s1242_s5, %s1031_s26  ;;  %p1751_p4 = scmp.lt.s32.totalorder %s1745_s18, %s1239_s4 }
 0x144   : > { %p1034_p1 = pnand %p1033_p3, %p1032_p2 }
 0x145   : > { %p1041_p11 = por %p1040_p6, %p1751_p4 }
 0x146   : > { %p1035_p7 = pneg %p1034_p1 }
 0x148   : > { %p1042_p8 = pnand %p1041_p11, %p1035_p7 }
 0x14a   : > { %1045 = shalt.err (!%p1042_p8)
}
 0x14b   : > { %s1046_s19 = scalar_lea.hbm %s285_s15, 128  ;;  %s1051_s12 = scalar_lea.hbm %s1746_s28, 256 }
 0x14c   : > { %p1047_p12 = scmp.ne.s32.totalorder %s285_s15, %s1046_s19  ;;  %p1052_p9 = scmp.lt.s32.totalorder %s285_s15, %s1746_s28 }
 0x14d   : > { %p1053_p13 = scmp.lt.s32.totalorder %s1051_s12, %s1046_s19 }
 0x14e   : > { %p1049_p0 = pnand %p1047_p12, %p1033_p3 }
 0x14f   : > { %p1054_p2 = por %p1053_p13, %p1052_p9 }
 0x150   : > { %p1050_p10 = pneg %p1049_p0 }
 0x152   : > { %p1055_p1 = pnand %p1054_p2, %p1050_p10 }
 0x154   : > { %1058 = shalt.err (!%p1055_p1)
}
 0x155   : > { %s1752_s4 = sld [smem:[#allocation53_spill]]  ;;  %p1754_p7 = scmp.ge.s32.totalorder %s1119_s14, 1 }
 0x156   : > { %751 = dma.vmem_to_hbm [thread:$0]  (!%p1599_p5), %s1745_s18, 128, %s285_s15, %s274_s30  }
 0x157   : > { %s300_s5 = scalar_lea.sflag [#allocation6], %s299_s2 }
 0x15b   : > { %p1753_p3 = scmp.ne.s32.totalorder %s1752_s4, 0 }
 0x15d   : > { %p753_p6 = pnand %p1754_p7, %p1753_p3 }
 0x15f   : > { %p754_p4 = pneg %p753_p6 }
 0x161   : > { %1106 = dma.done.wait (%p754_p4), %s300_s5, 128  }
 0x162   : > { %1108 = vsyncadd (%p754_p4), %s300_s5, 4294967168  ;;  %s1755_s14 = sld [smem:[#allocation51_spill]]  ;;  %s1757_s12 = smov %s1115_s13 }
 0x163   : > { %s1756_s23 = sld [smem:[#allocation52_spill]] }
 0x168   : > { %p16_p13 = scmp.ge.s32.totalorder %s1755_s14, 3  }
 0x169   : > { %s1758_s13 = smov %s1756_s23 }
 0x16a   :  { %18 = sbr.rel (!%p16_p13) target bundleno = 9 (0x9), region = 200 }
 0x16f   :  { %305 = vsyncpa [#allocation6], 1 }
 0x170   :  { %307 = vsyncpa [#allocation6 + $0x1], 1 }
 0x171   :  { %308 = vsyncmov [#allocation2] }
 0x174   :  { %s309_s25 = vpop.sfrf %308 }
 0x175   :  { %p602_p5 = scmp.ne.s32.totalorder %s309_s25, 0 }
 0x177   :  { %313 = shalt.err (%p602_p5)  }
 0x178   :  { %315 = vsyncmov [#allocation2 + $0x1] }
 0x17b   :  { %s316_s3 = vpop.sfrf %315 }
 0x17c   :  { %p603_p11 = scmp.ne.s32.totalorder %s316_s3, 0 }
 0x17e   :  { %320 = shalt.err (%p603_p11)  }
 0x17f   :  { %322 = vsyncmov [#allocation2 + $0x2] }
 0x182   :  { %s323_s10 = vpop.sfrf %322 }
 0x183   :  { %p604_p8 = scmp.ne.s32.totalorder %s323_s10, 0 }
 0x185   :  { %327 = shalt.err (%p604_p8)  }
 0x186   :  { %329 = vsyncmov [#allocation2 + $0x3] }
 0x189   :  { %s330_s27 = vpop.sfrf %329 }
 0x18a   :  { %p605_p12 = scmp.ne.s32.totalorder %s330_s27, 0 }
 0x18c   :  { %334 = shalt.err (%p605_p12)  }
 0x18d   :  { %336 = vsyncmov [#allocation2 + $0x4] }
 0x190   :  { %s337_s14 = vpop.sfrf %336 }
 0x191   :  { %p606_p0 = scmp.ne.s32.totalorder %s337_s14, 0 }
 0x193   :  { %341 = shalt.err (%p606_p0)  }
 0x194   :  { %343 = vsyncmov [#allocation2 + $0x5] }
 0x197   :  { %s344_s1 = vpop.sfrf %343 }
 0x198   :  { %p607_p10 = scmp.ne.s32.totalorder %s344_s1, 0 }
 0x19a   :  { %348 = shalt.err (%p607_p10)  }
 0x19b   :  { %350 = vsyncmov [#allocation2 + $0x6] }
 0x19e   :  { %s351_s13 = vpop.sfrf %350 }
 0x19f   :  { %p608_p9 = scmp.ne.s32.totalorder %s351_s13, 0 }
 0x1a1   :  { %355 = shalt.err (%p608_p9)  }
 0x1a2   :  { %357 = vsyncmov [#allocation2 + $0x7] }
 0x1a5   :  { %s358_s0 = vpop.sfrf %357 }
 0x1a6   :  { %p609_p2 = scmp.ne.s32.totalorder %s358_s0, 0 }
 0x1a8   :  { %362 = shalt.err (%p609_p2)  }
 0x1a9   :  { %364 = vsyncmov [#allocation2 + $0x8] }
 0x1ac   :  { %s365_s17 = vpop.sfrf %364 }
 0x1ad   :  { %p610_p1 = scmp.ne.s32.totalorder %s365_s17, 0 }
 0x1af   :  { %369 = shalt.err (%p610_p1)  }
 0x1b0   :  { %371 = vsyncmov [#allocation2 + $0x9] }
 0x1b3   :  { %s372_s16 = vpop.sfrf %371 }
 0x1b4   :  { %p611_p3 = scmp.ne.s32.totalorder %s372_s16, 0 }
 0x1b6   :  { %376 = shalt.err (%p611_p3)  }
 0x1b7   :  { %378 = vsyncmov [#allocation2 + $0xa] }
 0x1ba   :  { %s379_s8 = vpop.sfrf %378 }
 0x1bb   :  { %p612_p7 = scmp.ne.s32.totalorder %s379_s8, 0 }
 0x1bd   :  { %383 = shalt.err (%p612_p7)  }
 0x1be   :  { %385 = vsyncmov [#allocation2 + $0xb] }
 0x1c1   :  { %s386_s18 = vpop.sfrf %385 }
 0x1c2   :  { %p613_p6 = scmp.ne.s32.totalorder %s386_s18, 0 }
 0x1c4   :  { %390 = shalt.err (%p613_p6)  }
 0x1c5   :  { %392 = vsyncmov [#allocation2 + $0xc] }
 0x1c8   :  { %s393_s29 = vpop.sfrf %392 }
 0x1c9   :  { %p614_p4 = scmp.ne.s32.totalorder %s393_s29, 0 }
 0x1cb   :  { %397 = shalt.err (%p614_p4)  }
 0x1cc   :  { %399 = vsyncmov [#allocation2 + $0xd] }
 0x1cf   :  { %s400_s22 = vpop.sfrf %399 }
 0x1d0   :  { %p615_p13 = scmp.ne.s32.totalorder %s400_s22, 0 }
 0x1d2   :  { %404 = shalt.err (%p615_p13)  }
 0x1d3   :  { %406 = vsyncmov [#allocation2 + $0xe] }
 0x1d6   :  { %s407_s6 = vpop.sfrf %406 }
 0x1d7   :  { %p616_p5 = scmp.ne.s32.totalorder %s407_s6, 0 }
 0x1d9   :  { %411 = shalt.err (%p616_p5)  }
 0x1da   :  { %413 = vsyncmov [#allocation2 + $0xf] }
 0x1dd   :  { %s414_s28 = vpop.sfrf %413 }
 0x1de   :  { %p617_p11 = scmp.ne.s32.totalorder %s414_s28, 0 }
 0x1e0   :  { %418 = shalt.err (%p617_p11)  }
 0x1e1   :  { %420 = vsyncmov [#allocation2 + $0x10] }
 0x1e4   :  { %s421_s15 = vpop.sfrf %420 }
 0x1e5   :  { %p618_p8 = scmp.ne.s32.totalorder %s421_s15, 0 }
 0x1e7   :  { %425 = shalt.err (%p618_p8)  }
 0x1e8   :  { %427 = vsyncmov [#allocation2 + $0x11] }
 0x1eb   :  { %s428_s9 = vpop.sfrf %427 }
 0x1ec   :  { %p619_p12 = scmp.ne.s32.totalorder %s428_s9, 0 }
 0x1ee   :  { %432 = shalt.err (%p619_p12)  }
 0x1ef   :  { %434 = vsyncmov [#allocation2 + $0x12] }
 0x1f2   :  { %s435_s2 = vpop.sfrf %434 }
 0x1f3   :  { %p620_p0 = scmp.ne.s32.totalorder %s435_s2, 0 }
 0x1f5   :  { %439 = shalt.err (%p620_p0)  }
 0x1f6   :  { %441 = vsyncmov [#allocation2 + $0x13] }
 0x1f9   :  { %s442_s21 = vpop.sfrf %441 }
 0x1fa   :  { %p621_p10 = scmp.ne.s32.totalorder %s442_s21, 0 }
 0x1fc   :  { %446 = shalt.err (%p621_p10)  }
 0x1fd   :  { %448 = vsyncmov [#allocation2 + $0x14] }
 0x200   :  { %s449_s30 = vpop.sfrf %448 }
 0x201   :  { %p622_p9 = scmp.ne.s32.totalorder %s449_s30, 0 }
 0x203   :  { %453 = shalt.err (%p622_p9)  }
 0x204   :  { %455 = vsyncmov [#allocation2 + $0x15] }
 0x207   :  { %s456_s26 = vpop.sfrf %455 }
 0x208   :  { %p623_p2 = scmp.ne.s32.totalorder %s456_s26, 0 }
 0x20a   :  { %460 = shalt.err (%p623_p2)  }
 0x20b   :  { %462 = vsyncmov [#allocation2 + $0x16] }
 0x20e   :  { %s463_s19 = vpop.sfrf %462 }
 0x20f   :  { %p624_p1 = scmp.ne.s32.totalorder %s463_s19, 0 }
 0x211   :  { %467 = shalt.err (%p624_p1)  }
 0x212   :  { %469 = vsyncmov [#allocation2 + $0x17] }
 0x215   :  { %s470_s11 = vpop.sfrf %469 }
 0x216   :  { %p625_p3 = scmp.ne.s32.totalorder %s470_s11, 0 }
 0x218   :  { %474 = shalt.err (%p625_p3)  }
 0x219   :  { %476 = vsyncmov [#allocation2 + $0x18] }
 0x21c   :  { %s477_s20 = vpop.sfrf %476 }
 0x21d   :  { %p626_p7 = scmp.ne.s32.totalorder %s477_s20, 0 }
 0x21f   :  { %481 = shalt.err (%p626_p7)  }
 0x220   :  { %483 = vsyncmov [#allocation2 + $0x19] }
 0x223   :  { %s484_s12 = vpop.sfrf %483 }
 0x224   :  { %p627_p6 = scmp.ne.s32.totalorder %s484_s12, 0 }
 0x226   :  { %488 = shalt.err (%p627_p6)  }
 0x227   :  { %490 = vsyncmov [#allocation2 + $0x1a] }
 0x22a   :  { %s491_s24 = vpop.sfrf %490 }
 0x22b   :  { %p628_p4 = scmp.ne.s32.totalorder %s491_s24, 0 }
 0x22d   :  { %495 = shalt.err (%p628_p4)  }
 0x22e   :  { %497 = vsyncmov [#allocation2 + $0x1b] }
 0x231   :  { %s498_s7 = vpop.sfrf %497 }
 0x232   :  { %p629_p13 = scmp.ne.s32.totalorder %s498_s7, 0 }
 0x234   :  { %502 = shalt.err (%p629_p13)  }
 0x235   :  { %504 = vsyncmov [#allocation2 + $0x1c] }
 0x238   :  { %s505_s4 = vpop.sfrf %504 }
 0x239   :  { %p630_p5 = scmp.ne.s32.totalorder %s505_s4, 0 }
 0x23b   :  { %509 = shalt.err (%p630_p5)  }
 0x23c   :  { %511 = vsyncmov [#allocation2 + $0x1d] }
 0x23f   :  { %s512_s5 = vpop.sfrf %511 }
 0x240   :  { %p631_p11 = scmp.ne.s32.totalorder %s512_s5, 0 }
 0x242   :  { %516 = shalt.err (%p631_p11)  }
 0x243   :  { %518 = vsyncmov [#allocation2 + $0x1e] }
 0x246   :  { %s519_s23 = vpop.sfrf %518 }
 0x247   :  { %p632_p8 = scmp.ne.s32.totalorder %s519_s23, 0 }
 0x249   :  { %523 = shalt.err (%p632_p8)  }
 0x24a   :  { %525 = vsyncmov [#allocation2 + $0x1f] }
 0x24d   :  { %s526_s25 = vpop.sfrf %525 }
 0x24e   :  { %p633_p12 = scmp.ne.s32.totalorder %s526_s25, 0 }
 0x250   :  { %530 = shalt.err (%p633_p12)  }

</bundles_post_ra>
